<compile_context>
chip_gen: v6e
topology: v6e:2x2x1
jax: 0.10.0
libtpu: 0.0.40
codegen_flags: <defaults>
</compile_context>

<pallas_src>
import functools
import math

import numpy as np
import jax
import jax.numpy as jnp
from jax.experimental import pallas as pl
from jax.experimental.pallas import tpu as pltpu


def _round_up(x, m):
    return ((x + m - 1) // m) * m


def _mol_adapter_kernel(x1_ref, x2_ref, w1qkv_ref, b1qkv_ref, w2qkv_ref,
                        b2qkv_ref, m11_ref, m12_ref, m21_ref, m22_ref,
                        out1_ref, out2_ref, *, d_pad):
    f32 = jnp.float32
    dp = d_pad

    # Fused projection: x -> [Q | K*scale | V], each block Dp lanes wide.
    qkv1 = jnp.dot(x1_ref[...], w1qkv_ref[...],
                   preferred_element_type=f32) + b1qkv_ref[...]
    qkv2 = jnp.dot(x2_ref[...], w2qkv_ref[...],
                   preferred_element_type=f32) + b2qkv_ref[...]

    # 128-aligned lane slices (no relayout).
    q1, k1, v1 = qkv1[:, :dp], qkv1[:, dp:2 * dp], qkv1[:, 2 * dp:]
    q2, k2, v2 = qkv2[:, :dp], qkv2[:, dp:2 * dp], qkv2[:, 2 * dp:]

    # Q @ K^T without an explicit transpose; scale is already folded into K.
    dn = (((1,), (1,)), ((), ()))
    l11 = jax.lax.dot_general(q1, k1, dn, preferred_element_type=f32) + m11_ref[...]
    l12 = jax.lax.dot_general(q1, k2, dn, preferred_element_type=f32) + m12_ref[...]
    l21 = jax.lax.dot_general(q2, k1, dn, preferred_element_type=f32) + m21_ref[...]
    l22 = jax.lax.dot_general(q2, k2, dn, preferred_element_type=f32) + m22_ref[...]

    def attend(q, la, lb, va, vb):
        m = jnp.maximum(jnp.max(la, axis=-1, keepdims=True),
                        jnp.max(lb, axis=-1, keepdims=True))
        pa = jnp.exp(la - m)
        pb = jnp.exp(lb - m)
        s = jnp.sum(pa, axis=-1, keepdims=True) + jnp.sum(pb, axis=-1, keepdims=True)
        av = (jnp.dot(pa, va, preferred_element_type=f32)
              + jnp.dot(pb, vb, preferred_element_type=f32))
        # Softmax normalization folded after the A@V matmul (exact recip to
        # hold the 2e-4 reference tolerance).
        return q + av * pl.reciprocal(s, approx=False)

    out1_ref[...] = attend(q1, l11, l12, v1, v2).astype(out1_ref.dtype)
    out2_ref[...] = attend(q2, l21, l22, v1, v2).astype(out2_ref.dtype)


def mol_adapter_forward(drug1, drug2, params, *, target_rows=256):
    """drug1: [B, N1, H], drug2: [B, N2, H] -> ([B, N1, D], [B, N2, D])."""
    B, N1, H = drug1.shape
    B2, N2, H2 = drug2.shape
    assert B == B2 and H == H2
    D = params["w_q"].shape[1]

    Dp = _round_up(max(D, 128), 128)          # lane-dense Q/K/V blocks & output
    N1p = _round_up(N1, 8)                     # sublane-aligned node counts
    N2p = _round_up(N2, 8)
    scale = 1.0 / math.sqrt(D)                 # true D, not padded width

    # ---- offline weight fusion: fold W_1/W_2 into [W_Q | W_K*scale | W_V],
    # zero-padding each column block to Dp lanes. -----------------------------
    def pad_cols(w, width):
        return jnp.pad(w, ((0, 0), (0, width - w.shape[1])))

    def fuse(w_seg, b_seg):
        wb, bb = [], []
        for wp, bp, s in ((params["w_q"], params["b_q"], 1.0),
                          (params["w_k"], params["b_k"], scale),
                          (params["w_v"], params["b_v"], 1.0)):
            ws = wp * s
            wb.append(pad_cols(w_seg @ ws, Dp))
            bb.append(pad_cols(b_seg @ ws + bp * s, Dp))
        return jnp.concatenate(wb, axis=1), jnp.concatenate(bb, axis=1)

    w1qkv, b1qkv = fuse(params["w_1"], params["b_1"])
    w2qkv, b2qkv = fuse(params["w_2"], params["b_2"])

    # ---- node padding (sublane alignment, masked out of the softmax). -------
    if N1p != N1:
        drug1 = jnp.pad(drug1, ((0, 0), (0, N1p - N1), (0, 0)))
    if N2p != N2:
        drug2 = jnp.pad(drug2, ((0, 0), (0, N2p - N2), (0, 0)))

    # ---- batch tiling: target ~target_rows rows/segment per grid step, but
    # always >= 2 grid steps when B >= 2 (both v7x TensorCores get work). -----
    TB = max(1, min(B, target_rows // max(N1p, N2p)))
    if B >= 2:
        TB = min(TB, -(-B // 2))
    nb = pl.cdiv(B, TB)
    Bp = nb * TB
    if Bp != B:
        drug1 = jnp.pad(drug1, ((0, Bp - B), (0, 0), (0, 0)))
        drug2 = jnp.pad(drug2, ((0, Bp - B), (0, 0), (0, 0)))

    # Flatten (batch, node) into the matmul M dimension (row-dense slabs).
    x1 = drug1.reshape(Bp * N1p, H)
    x2 = drug2.reshape(Bp * N2p, H)
    M1, M2 = TB * N1p, TB * N2p

    # ---- trace-time additive masks: 0 where (same batch AND real key node),
    # -1e30 elsewhere (cross-batch pairs and padded key nodes). ---------------
    def mask_block(nq_p, nk_p, nk_real):
        rq = np.arange(TB * nq_p) // nq_p
        ck = np.arange(TB * nk_p) // nk_p
        same = rq[:, None] == ck[None, :]
        valid = (np.arange(TB * nk_p) % nk_p) < nk_real
        return jnp.asarray(
            np.where(same & valid[None, :], 0.0, -1e30).astype(np.float32))

    m11 = mask_block(N1p, N1p, N1)
    m12 = mask_block(N1p, N2p, N2)
    m21 = mask_block(N2p, N1p, N1)
    m22 = mask_block(N2p, N2p, N2)

    def const_spec(shape):
        ndim = len(shape)
        return pl.BlockSpec(shape, lambda b, _n=ndim: (0,) * _n)

    grid_spec = pltpu.PrefetchScalarGridSpec(
        num_scalar_prefetch=0,
        grid=(nb,),
        in_specs=[
            pl.BlockSpec((M1, H), lambda b: (b, 0)),   # drug1 rows (flattened)
            pl.BlockSpec((M2, H), lambda b: (b, 0)),   # drug2 rows (flattened)
            const_spec((H, 3 * Dp)),                   # W_1 folded into [Q|K|V]
            const_spec((1, 3 * Dp)),
            const_spec((H, 3 * Dp)),                   # W_2 folded into [Q|K|V]
            const_spec((1, 3 * Dp)),
            const_spec((M1, M1)),                      # block-diag / pad masks
            const_spec((M1, M2)),
            const_spec((M2, M1)),
            const_spec((M2, M2)),
        ],
        out_specs=[
            pl.BlockSpec((M1, Dp), lambda b: (b, 0)),
            pl.BlockSpec((M2, Dp), lambda b: (b, 0)),
        ],
    )

    out1_flat, out2_flat = pl.pallas_call(
        functools.partial(_mol_adapter_kernel, d_pad=Dp),
        out_shape=(
            jax.ShapeDtypeStruct((Bp * N1p, Dp), jnp.float32),
            jax.ShapeDtypeStruct((Bp * N2p, Dp), jnp.float32),
        ),
        grid_spec=grid_spec,
        compiler_params=pltpu.CompilerParams(
            dimension_semantics=("parallel",)),
    )(x1, x2, w1qkv, b1qkv, w2qkv, b2qkv, m11, m12, m21, m22)

    out1 = out1_flat.reshape(Bp, N1p, Dp)[:B, :N1, :D]
    out2 = out2_flat.reshape(Bp, N2p, Dp)[:B, :N2, :D]
    return out1, out2


def mol_adapter_reference(drug1, drug2, params):
    """Plain-JAX reference matching the PyTorch forward."""
    d1 = drug1 @ params["w_1"] + params["b_1"]
    d2 = drug2 @ params["w_2"] + params["b_2"]
    n1 = d1.shape[1]
    x = jnp.concatenate([d1, d2], axis=1)
    q = x @ params["w_q"] + params["b_q"]
    k = x @ params["w_k"] + params["b_k"]
    v = x @ params["w_v"] + params["b_v"]
    a = (q @ jnp.swapaxes(k, -1, -2)) / math.sqrt(q.shape[-1])
    a = jax.nn.softmax(a, axis=-1)
    out = q + a @ v
    return out[:, :n1, :], out[:, n1:, :]


def init_params(key, hidden_dim, output_dim):
    keys = jax.random.split(key, 10)

    def lin(kw, kb, fan_in, fan_out):
        bound = 1.0 / math.sqrt(fan_in)
        w = jax.random.uniform(kw, (fan_in, fan_out), jnp.float32, -bound, bound)
        b = jax.random.uniform(kb, (1, fan_out), jnp.float32, -bound, bound)
        return w, b

    w1, b1 = lin(keys[0], keys[1], hidden_dim, output_dim)
    w2, b2 = lin(keys[2], keys[3], hidden_dim, output_dim)
    wq, bq = lin(keys[4], keys[5], output_dim, output_dim)
    wk, bk = lin(keys[6], keys[7], output_dim, output_dim)
    wv, bv = lin(keys[8], keys[9], output_dim, output_dim)
    return {
        "w_1": w1, "b_1": b1,
        "w_2": w2, "b_2": b2,
        "w_q": wq, "b_q": bq,
        "w_k": wk, "b_k": bk,
        "w_v": wv, "b_v": bv,
    }


if __name__ == "__main__":
    # Full-precision f32 matmuls for the wrapper-side weight fusion and the
    # reference, so the 2e-4 comparison is meaningful.
    jax.config.update("jax_default_matmul_precision", "highest")

    B, N1, N2, HIDDEN, OUT = 2, 8, 6, 32, 32

    key = jax.random.PRNGKey(0)
    k1, k2, kp = jax.random.split(key, 3)
    drug1 = jax.random.normal(k1, (B, N1, HIDDEN), jnp.float32)
    drug2 = jax.random.normal(k2, (B, N2, HIDDEN), jnp.float32)
    params = init_params(kp, HIDDEN, OUT)

    out1, out2 = mol_adapter_forward(drug1, drug2, params)
    jax.block_until_ready((out1, out2))

    ref1, ref2 = mol_adapter_reference(drug1, drug2, params)
    assert out1.shape == (B, N1, OUT) and out2.shape == (B, N2, OUT)
    assert jnp.allclose(out1, ref1, atol=2e-4, rtol=2e-4)
    assert jnp.allclose(out2, ref2, atol=2e-4, rtol=2e-4)

    print("KERNEL_OK")
</pallas_src>

<mosaic_0001>
module attributes {stable_mosaic.version = 11 : i64} {
  func.func @_mol_adapter_kernel(%arg0: i32, %arg1: memref<8x32xf32, #tpu.memory_space<vmem>>, %arg2: memref<8x32xf32, #tpu.memory_space<vmem>>, %arg3: memref<32x384xf32, #tpu.memory_space<vmem>>, %arg4: memref<1x384xf32, #tpu.memory_space<vmem>>, %arg5: memref<32x384xf32, #tpu.memory_space<vmem>>, %arg6: memref<1x384xf32, #tpu.memory_space<vmem>>, %arg7: memref<8x8xf32, #tpu.memory_space<vmem>>, %arg8: memref<8x8xf32, #tpu.memory_space<vmem>>, %arg9: memref<8x8xf32, #tpu.memory_space<vmem>>, %arg10: memref<8x8xf32, #tpu.memory_space<vmem>>, %arg11: memref<8x128xf32, #tpu.memory_space<vmem>>, %arg12: memref<8x128xf32, #tpu.memory_space<vmem>>) attributes {dimension_semantics = [#tpu.dimension_semantics<parallel>], iteration_bounds = array<i64: 2>, scalar_prefetch = 0 : i64, scratch_operands = 0 : i64, tpu.core_type = #tpu.core_type<tc>, window_params = [{transform_indices = @transform_0, window_bounds = array<i64: 8, 32>}, {transform_indices = @transform_1, window_bounds = array<i64: 8, 32>}, {pipeline_mode = #tpu.pipeline_mode<synchronous>, transform_indices = @transform_2, window_bounds = array<i64: 32, 384>}, {pipeline_mode = #tpu.pipeline_mode<synchronous>, transform_indices = @transform_3, window_bounds = array<i64: 1, 384>}, {pipeline_mode = #tpu.pipeline_mode<synchronous>, transform_indices = @transform_4, window_bounds = array<i64: 32, 384>}, {pipeline_mode = #tpu.pipeline_mode<synchronous>, transform_indices = @transform_5, window_bounds = array<i64: 1, 384>}, {pipeline_mode = #tpu.pipeline_mode<synchronous>, transform_indices = @transform_6, window_bounds = array<i64: 8, 8>}, {pipeline_mode = #tpu.pipeline_mode<synchronous>, transform_indices = @transform_7, window_bounds = array<i64: 8, 8>}, {pipeline_mode = #tpu.pipeline_mode<synchronous>, transform_indices = @transform_8, window_bounds = array<i64: 8, 8>}, {pipeline_mode = #tpu.pipeline_mode<synchronous>, transform_indices = @transform_9, window_bounds = array<i64: 8, 8>}, {transform_indices = @transform_10, window_bounds = array<i64: 8, 128>}, {transform_indices = @transform_11, window_bounds = array<i64: 8, 128>}]} {
    %c0 = arith.constant 0 : index
    %c0_0 = arith.constant 0 : index
    %0 = vector.load %arg1[%c0, %c0_0] : memref<8x32xf32, #tpu.memory_space<vmem>>, vector<8x32xf32>
    %c0_1 = arith.constant 0 : index
    %c0_2 = arith.constant 0 : index
    %1 = vector.load %arg3[%c0_1, %c0_2] : memref<32x384xf32, #tpu.memory_space<vmem>>, vector<32x384xf32>
    %cst = arith.constant dense<0.000000e+00> : vector<8x384xf32>
    %2 = tpu.matmul %0, %1, %cst {dimension_numbers = #tpu.dot_dimension_numbers<[1], [0], [0], [1], [0, 0, 1, 1], [], []>, precision = #tpu.contract_precision<fp32>} : vector<8x32xf32>, vector<32x384xf32>, vector<8x384xf32> -> vector<8x384xf32>
    %c0_3 = arith.constant 0 : index
    %c0_4 = arith.constant 0 : index
    %3 = vector.load %arg4[%c0_3, %c0_4] : memref<1x384xf32, #tpu.memory_space<vmem>>, vector<1x384xf32>
    %4 = vector.broadcast %3 : vector<1x384xf32> to vector<8x384xf32>
    %5 = arith.addf %2, %4 : vector<8x384xf32>
    %c0_5 = arith.constant 0 : index
    %c0_6 = arith.constant 0 : index
    %6 = vector.load %arg2[%c0_5, %c0_6] : memref<8x32xf32, #tpu.memory_space<vmem>>, vector<8x32xf32>
    %c0_7 = arith.constant 0 : index
    %c0_8 = arith.constant 0 : index
    %7 = vector.load %arg5[%c0_7, %c0_8] : memref<32x384xf32, #tpu.memory_space<vmem>>, vector<32x384xf32>
    %cst_9 = arith.constant dense<0.000000e+00> : vector<8x384xf32>
    %8 = tpu.matmul %6, %7, %cst_9 {dimension_numbers = #tpu.dot_dimension_numbers<[1], [0], [0], [1], [0, 0, 1, 1], [], []>, precision = #tpu.contract_precision<fp32>} : vector<8x32xf32>, vector<32x384xf32>, vector<8x384xf32> -> vector<8x384xf32>
    %c0_10 = arith.constant 0 : index
    %c0_11 = arith.constant 0 : index
    %9 = vector.load %arg6[%c0_10, %c0_11] : memref<1x384xf32, #tpu.memory_space<vmem>>, vector<1x384xf32>
    %10 = vector.broadcast %9 : vector<1x384xf32> to vector<8x384xf32>
    %11 = arith.addf %8, %10 : vector<8x384xf32>
    %12 = vector.extract_strided_slice %5 {offsets = [0, 0], sizes = [8, 128], strides = [1, 1]} : vector<8x384xf32> to vector<8x128xf32>
    %13 = vector.extract_strided_slice %5 {offsets = [0, 128], sizes = [8, 128], strides = [1, 1]} : vector<8x384xf32> to vector<8x128xf32>
    %14 = vector.extract_strided_slice %5 {offsets = [0, 256], sizes = [8, 128], strides = [1, 1]} : vector<8x384xf32> to vector<8x128xf32>
    %15 = vector.extract_strided_slice %11 {offsets = [0, 0], sizes = [8, 128], strides = [1, 1]} : vector<8x384xf32> to vector<8x128xf32>
    %16 = vector.extract_strided_slice %11 {offsets = [0, 128], sizes = [8, 128], strides = [1, 1]} : vector<8x384xf32> to vector<8x128xf32>
    %17 = vector.extract_strided_slice %11 {offsets = [0, 256], sizes = [8, 128], strides = [1, 1]} : vector<8x384xf32> to vector<8x128xf32>
    %cst_12 = arith.constant dense<0.000000e+00> : vector<8x8xf32>
    %18 = tpu.matmul %12, %13, %cst_12 {dimension_numbers = #tpu.dot_dimension_numbers<[1], [1], [0], [0], [0, 0, 1, 0], [], []>, precision = #tpu.contract_precision<fp32>} : vector<8x128xf32>, vector<8x128xf32>, vector<8x8xf32> -> vector<8x8xf32>
    %c0_13 = arith.constant 0 : index
    %c0_14 = arith.constant 0 : index
    %19 = vector.load %arg7[%c0_13, %c0_14] : memref<8x8xf32, #tpu.memory_space<vmem>>, vector<8x8xf32>
    %20 = arith.addf %18, %19 : vector<8x8xf32>
    %cst_15 = arith.constant dense<0.000000e+00> : vector<8x8xf32>
    %21 = tpu.matmul %12, %16, %cst_15 {dimension_numbers = #tpu.dot_dimension_numbers<[1], [1], [0], [0], [0, 0, 1, 0], [], []>, precision = #tpu.contract_precision<fp32>} : vector<8x128xf32>, vector<8x128xf32>, vector<8x8xf32> -> vector<8x8xf32>
    %c0_16 = arith.constant 0 : index
    %c0_17 = arith.constant 0 : index
    %22 = vector.load %arg8[%c0_16, %c0_17] : memref<8x8xf32, #tpu.memory_space<vmem>>, vector<8x8xf32>
    %23 = arith.addf %21, %22 : vector<8x8xf32>
    %cst_18 = arith.constant dense<0.000000e+00> : vector<8x8xf32>
    %24 = tpu.matmul %15, %13, %cst_18 {dimension_numbers = #tpu.dot_dimension_numbers<[1], [1], [0], [0], [0, 0, 1, 0], [], []>, precision = #tpu.contract_precision<fp32>} : vector<8x128xf32>, vector<8x128xf32>, vector<8x8xf32> -> vector<8x8xf32>
    %c0_19 = arith.constant 0 : index
    %c0_20 = arith.constant 0 : index
    %25 = vector.load %arg9[%c0_19, %c0_20] : memref<8x8xf32, #tpu.memory_space<vmem>>, vector<8x8xf32>
    %26 = arith.addf %24, %25 : vector<8x8xf32>
    %cst_21 = arith.constant dense<0.000000e+00> : vector<8x8xf32>
    %27 = tpu.matmul %15, %16, %cst_21 {dimension_numbers = #tpu.dot_dimension_numbers<[1], [1], [0], [0], [0, 0, 1, 0], [], []>, precision = #tpu.contract_precision<fp32>} : vector<8x128xf32>, vector<8x128xf32>, vector<8x8xf32> -> vector<8x8xf32>
    %c0_22 = arith.constant 0 : index
    %c0_23 = arith.constant 0 : index
    %28 = vector.load %arg10[%c0_22, %c0_23] : memref<8x8xf32, #tpu.memory_space<vmem>>, vector<8x8xf32>
    %29 = arith.addf %27, %28 : vector<8x8xf32>
    %cst_24 = arith.constant dense<0xFF800000> : vector<8xf32>
    %30 = vector.multi_reduction <maximumf>, %20, %cst_24 [1] : vector<8x8xf32> to vector<8xf32>
    %31 = vector.shape_cast %30 : vector<8xf32> to vector<8x1xf32>
    %cst_25 = arith.constant dense<0xFF800000> : vector<8xf32>
    %32 = vector.multi_reduction <maximumf>, %23, %cst_25 [1] : vector<8x8xf32> to vector<8xf32>
    %33 = vector.shape_cast %32 : vector<8xf32> to vector<8x1xf32>
    %34 = arith.maximumf %31, %33 : vector<8x1xf32>
    %35 = vector.broadcast %34 : vector<8x1xf32> to vector<8x8xf32>
    %36 = arith.subf %20, %35 : vector<8x8xf32>
    %37 = math.exp %36 : vector<8x8xf32>
    %38 = vector.broadcast %34 : vector<8x1xf32> to vector<8x8xf32>
    %39 = arith.subf %23, %38 : vector<8x8xf32>
    %40 = math.exp %39 : vector<8x8xf32>
    %cst_26 = arith.constant dense<0.000000e+00> : vector<8xf32>
    %41 = vector.multi_reduction <add>, %37, %cst_26 [1] : vector<8x8xf32> to vector<8xf32>
    %42 = vector.shape_cast %41 : vector<8xf32> to vector<8x1xf32>
    %cst_27 = arith.constant dense<0.000000e+00> : vector<8xf32>
    %43 = vector.multi_reduction <add>, %40, %cst_27 [1] : vector<8x8xf32> to vector<8xf32>
    %44 = vector.shape_cast %43 : vector<8xf32> to vector<8x1xf32>
    %45 = arith.addf %42, %44 : vector<8x1xf32>
    %cst_28 = arith.constant dense<0.000000e+00> : vector<8x128xf32>
    %46 = tpu.matmul %37, %14, %cst_28 {dimension_numbers = #tpu.dot_dimension_numbers<[1], [0], [0], [1], [0, 0, 1, 1], [], []>, precision = #tpu.contract_precision<fp32>} : vector<8x8xf32>, vector<8x128xf32>, vector<8x128xf32> -> vector<8x128xf32>
    %cst_29 = arith.constant dense<0.000000e+00> : vector<8x128xf32>
    %47 = tpu.matmul %40, %17, %cst_29 {dimension_numbers = #tpu.dot_dimension_numbers<[1], [0], [0], [1], [0, 0, 1, 1], [], []>, precision = #tpu.contract_precision<fp32>} : vector<8x8xf32>, vector<8x128xf32>, vector<8x128xf32> -> vector<8x128xf32>
    %48 = arith.addf %46, %47 : vector<8x128xf32>
    %49 = tpu.reciprocal %45 : vector<8x1xf32> -> vector<8x1xf32>
    %50 = vector.broadcast %49 : vector<8x1xf32> to vector<8x128xf32>
    %51 = arith.mulf %48, %50 : vector<8x128xf32>
    %52 = arith.addf %12, %51 : vector<8x128xf32>
    %c0_30 = arith.constant 0 : index
    %c0_31 = arith.constant 0 : index
    %53 = vector.load %arg11[%c0_30, %c0_31] : memref<8x128xf32, #tpu.memory_space<vmem>>, vector<8x128xf32>
    tpu.vector_store %arg11[%c0_30, %c0_31], %52 {strides = array<i32>} : memref<8x128xf32, #tpu.memory_space<vmem>>, vector<8x128xf32>,
    %cst_32 = arith.constant dense<0xFF800000> : vector<8xf32>
    %54 = vector.multi_reduction <maximumf>, %26, %cst_32 [1] : vector<8x8xf32> to vector<8xf32>
    %55 = vector.shape_cast %54 : vector<8xf32> to vector<8x1xf32>
    %cst_33 = arith.constant dense<0xFF800000> : vector<8xf32>
    %56 = vector.multi_reduction <maximumf>, %29, %cst_33 [1] : vector<8x8xf32> to vector<8xf32>
    %57 = vector.shape_cast %56 : vector<8xf32> to vector<8x1xf32>
    %58 = arith.maximumf %55, %57 : vector<8x1xf32>
    %59 = vector.broadcast %58 : vector<8x1xf32> to vector<8x8xf32>
    %60 = arith.subf %26, %59 : vector<8x8xf32>
    %61 = math.exp %60 : vector<8x8xf32>
    %62 = vector.broadcast %58 : vector<8x1xf32> to vector<8x8xf32>
    %63 = arith.subf %29, %62 : vector<8x8xf32>
    %64 = math.exp %63 : vector<8x8xf32>
    %cst_34 = arith.constant dense<0.000000e+00> : vector<8xf32>
    %65 = vector.multi_reduction <add>, %61, %cst_34 [1] : vector<8x8xf32> to vector<8xf32>
    %66 = vector.shape_cast %65 : vector<8xf32> to vector<8x1xf32>
    %cst_35 = arith.constant dense<0.000000e+00> : vector<8xf32>
    %67 = vector.multi_reduction <add>, %64, %cst_35 [1] : vector<8x8xf32> to vector<8xf32>
    %68 = vector.shape_cast %67 : vector<8xf32> to vector<8x1xf32>
    %69 = arith.addf %66, %68 : vector<8x1xf32>
    %cst_36 = arith.constant dense<0.000000e+00> : vector<8x128xf32>
    %70 = tpu.matmul %61, %14, %cst_36 {dimension_numbers = #tpu.dot_dimension_numbers<[1], [0], [0], [1], [0, 0, 1, 1], [], []>, precision = #tpu.contract_precision<fp32>} : vector<8x8xf32>, vector<8x128xf32>, vector<8x128xf32> -> vector<8x128xf32>
    %cst_37 = arith.constant dense<0.000000e+00> : vector<8x128xf32>
    %71 = tpu.matmul %64, %17, %cst_37 {dimension_numbers = #tpu.dot_dimension_numbers<[1], [0], [0], [1], [0, 0, 1, 1], [], []>, precision = #tpu.contract_precision<fp32>} : vector<8x8xf32>, vector<8x128xf32>, vector<8x128xf32> -> vector<8x128xf32>
    %72 = arith.addf %70, %71 : vector<8x128xf32>
    %73 = tpu.reciprocal %69 : vector<8x1xf32> -> vector<8x1xf32>
    %74 = vector.broadcast %73 : vector<8x1xf32> to vector<8x128xf32>
    %75 = arith.mulf %72, %74 : vector<8x128xf32>
    %76 = arith.addf %15, %75 : vector<8x128xf32>
    %c0_38 = arith.constant 0 : index
    %c0_39 = arith.constant 0 : index
    %77 = vector.load %arg12[%c0_38, %c0_39] : memref<8x128xf32, #tpu.memory_space<vmem>>, vector<8x128xf32>
    tpu.vector_store %arg12[%c0_38, %c0_39], %76 {strides = array<i32>} : memref<8x128xf32, #tpu.memory_space<vmem>>, vector<8x128xf32>,
    return
  }
  func.func @transform_0(%arg0: i32) -> (i32, i32) {
    %c0_i32 = arith.constant 0 : i32
    %c0_i32_0 = arith.constant 0 : i32
    return %arg0, %c0_i32 : i32, i32
  }
  func.func @transform_1(%arg0: i32) -> (i32, i32) {
    %c0_i32 = arith.constant 0 : i32
    %c0_i32_0 = arith.constant 0 : i32
    return %arg0, %c0_i32 : i32, i32
  }
  func.func @transform_2(%arg0: i32) -> (i32, i32) {
    %c0_i32 = arith.constant 0 : i32
    %c0_i32_0 = arith.constant 0 : i32
    %c0_i32_1 = arith.constant 0 : i32
    return %c0_i32, %c0_i32_0 : i32, i32
  }
  func.func @transform_3(%arg0: i32) -> (i32, i32) {
    %c0_i32 = arith.constant 0 : i32
    %c0_i32_0 = arith.constant 0 : i32
    %c0_i32_1 = arith.constant 0 : i32
    return %c0_i32, %c0_i32_0 : i32, i32
  }
  func.func @transform_4(%arg0: i32) -> (i32, i32) {
    %c0_i32 = arith.constant 0 : i32
    %c0_i32_0 = arith.constant 0 : i32
    %c0_i32_1 = arith.constant 0 : i32
    return %c0_i32, %c0_i32_0 : i32, i32
  }
  func.func @transform_5(%arg0: i32) -> (i32, i32) {
    %c0_i32 = arith.constant 0 : i32
    %c0_i32_0 = arith.constant 0 : i32
    %c0_i32_1 = arith.constant 0 : i32
    return %c0_i32, %c0_i32_0 : i32, i32
  }
  func.func @transform_6(%arg0: i32) -> (i32, i32) {
    %c0_i32 = arith.constant 0 : i32
    %c0_i32_0 = arith.constant 0 : i32
    %c0_i32_1 = arith.constant 0 : i32
    return %c0_i32, %c0_i32_0 : i32, i32
  }
  func.func @transform_7(%arg0: i32) -> (i32, i32) {
    %c0_i32 = arith.constant 0 : i32
    %c0_i32_0 = arith.constant 0 : i32
    %c0_i32_1 = arith.constant 0 : i32
    return %c0_i32, %c0_i32_0 : i32, i32
  }
  func.func @transform_8(%arg0: i32) -> (i32, i32) {
    %c0_i32 = arith.constant 0 : i32
    %c0_i32_0 = arith.constant 0 : i32
    %c0_i32_1 = arith.constant 0 : i32
    return %c0_i32, %c0_i32_0 : i32, i32
  }
  func.func @transform_9(%arg0: i32) -> (i32, i32) {
    %c0_i32 = arith.constant 0 : i32
    %c0_i32_0 = arith.constant 0 : i32
    %c0_i32_1 = arith.constant 0 : i32
    return %c0_i32, %c0_i32_0 : i32, i32
  }
  func.func @transform_10(%arg0: i32) -> (i32, i32) {
    %c0_i32 = arith.constant 0 : i32
    %c0_i32_0 = arith.constant 0 : i32
    return %arg0, %c0_i32 : i32, i32
  }
  func.func @transform_11(%arg0: i32) -> (i32, i32) {
    %c0_i32 = arith.constant 0 : i32
    %c0_i32_0 = arith.constant 0 : i32
    return %arg0, %c0_i32 : i32, i32
  }
}

</mosaic_0001>

<bundles_post_ra>
// kernel: tpu_custom_call.1
= control target key start
LH: loop header
LB: loop body
LE: loop exit
PB: predicated region body
PF: predicated region fallthrough
CT: control target
= control target key end

     0   :  { %s8700_s0 = inlined_call_operand.hbm [shape: f32[16,32], index: 0, kind: input, shape index: {}]   ;;  %s8701_s1 = inlined_call_operand.hbm [shape: f32[16,32], index: 1, kind: input, shape index: {}]   ;;  %s8702_s2 = inlined_call_operand.hbm [shape: f32[32,384], index: 2, kind: input, shape index: {}]   ;;  %s8703_s3 = inlined_call_operand.hbm [shape: f32[1,384], index: 3, kind: input, shape index: {}]   ;;  %s8704_s4 = inlined_call_operand.hbm [shape: f32[32,384], index: 4, kind: input, shape index: {}]   ;;  %s8705_s5 = inlined_call_operand.hbm [shape: f32[1,384], index: 5, kind: input, shape index: {}]   ;;  %s8706_s6 = inlined_call_operand.vmem [shape: f32[8,8], index: 6, kind: input, shape index: {}]   ;;  %s8707_s7 = inlined_call_operand.hbm [shape: f32[8,8], index: 7, kind: input, shape index: {}]   ;;  %s8708_s8 = inlined_call_operand.hbm [shape: f32[8,8], index: 8, kind: input, shape index: {}]   ;;  %s8709_s9 = inlined_call_operand.vmem [shape: f32[8,8], index: 9, kind: input, shape index: {}]   ;;  %s8710_s10 = inlined_call_operand.hbm [shape: f32[16,128], index: 10, kind: output, shape index: {0}]   ;;  %s8711_s11 = inlined_call_operand.hbm [shape: f32[16,128], index: 11, kind: output, shape index: {1}]  }
   0x1   :  { %8718 = sst [smem:[#allocation29_spill]] %s8702_s2 }
   0x2   :  { %8719 = sst [smem:[#allocation30_spill]] %s8703_s3 }
   0x3   :  { %8720 = sst [smem:[#allocation31_spill]] %s8704_s4 }
   0x4   :  { %8721 = sst [smem:[#allocation32_spill]] %s8705_s5 }
   0x5   :  { %8722 = sst [smem:[#allocation33_spill]] %s8707_s7 }
   0x6   :  { %8723 = sst [smem:[#allocation34_spill]] %s8708_s8 }
   0x7   :  { %17 = vsyncpa [#allocation3], 0 }
   0x8   :  { %19 = vsyncpa [#allocation3 + $0x1], 0 }
   0x9   :  { %20 = vsyncpa [#allocation6], 0 }
   0xa   :  { %22 = vsyncpa [#allocation6 + $0x1], 0 }
   0xb   :  { %23 = vsyncpa [#allocation9], 0 }
   0xc   :  { %24 = vsyncpa [#allocation12], 0 }
   0xd   :  { %25 = vsyncpa [#allocation15], 0 }
   0xe   :  { %26 = vsyncpa [#allocation4], 0 }
   0xf   :  { %28 = vsyncpa [#allocation4 + $0x1], 0 }
  0x10   :  { %29 = vsyncpa [#allocation18], 0 }
  0x11   :  { %31 = vsyncpa [#allocation18 + $0x1], 0  ;;  %s7592_s17 = smov 0   ;;  %s7594_s18 = smov 0  }
  0x12   :  { %s7596_s19 = smov 0   ;;  %s7598_s20 = smov 0  }
  0x13 LB: > { %8724 = sst [smem:[#allocation27_spill]] %s7512_s19  ;;  %s7518_s21 = smov [#allocation7]   ;;  %s7516_s20 = sphi %s7598_s20, %s8758_s20   ;;  %s7512_s19 = sphi %s7596_s19, %s8755_s19   ;;  %s7508_s18 = sphi %s7594_s18, %s8757_s18   ;;  %s7504_s17 = sphi %s7592_s17, %s8756_s17  }
  0x14   : > { %s326_s22 = sshll.u32 %s7518_s21, 4  ;;  %s7613_s23 = sadd.s32 4294967295, %s7516_s20   ;;  %s327_s22 = int_to_ptr.vmem [resolvable:$true] %s326_s22 }
  0x15   : > { %p6500_p0 = scmp.ge.s32.totalorder %s7516_s20, 1  ;;  %p8714_p1 = scmp.eq.s32.totalorder %s7613_s23, 0 }
  0x16   : > { %p314_p2 = scmp.lt.s32.totalorder %s7516_s20, 3  ;;  %s7519_s25 = smov [#allocation8]  }
  0x17   : > { %s340_s26 = sshll.u32 %s7519_s25, 4  ;;  %s7520_s28 = smov [#allocation11]   ;;  %s341_s26 = int_to_ptr.vmem [resolvable:$true] %s340_s26 }
  0x18   : > { %p7618_p3 = pnand %p6500_p0, %p314_p2  ;;  %s364_s29 = sshll.u32 %s7520_s28, 4  ;;  %s7631_s29 = int_to_ptr.vmem [resolvable:$true] %s364_s29 }
  0x19   : > { %s7201_s12 = scalar_lea.vmem %s327_s22, 1536  ;;  %p7209_p11 = scmp.lt.s32.totalorder %s327_s22, %s327_s22 }
  0x1a   : > { %s8725_s24 = scalar_select %p7618_p3, 1, 0 }
  0x1b   : > { %p7089_p5 = pneg %p7618_p3  ;;  %p7202_p8 = scmp.ne.s32.totalorder %s327_s22, %s7201_s12 }
  0x1c   : > { %p7210_p12 = scmp.lt.s32.totalorder %s7201_s12, %s7201_s12 }
  0x1d   : > { %p7627_p6 = pnand %p7089_p5, %p8714_p1 }
  0x1e   : > { %p7211_p13 = por %p7210_p12, %p7209_p11 }
  0x1f   : > { %p7635_p7 = pneg %p7627_p6 }
  0x21   : > { %p7204_p9 = pnand %p7202_p8, %p7635_p7 }
  0x23   : > { %p7205_p10 = pneg %p7204_p9 }
  0x25   : > { %p7212_p0 = pnand %p7211_p13, %p7205_p10 }
  0x27   : > { %7215 = shalt.err (!%p7212_p0)
}
  0x28   : > { %s8712_s13 = smov 384   ;;  %s7522_s14 = smov 24  }
  0x29   : > { %s8728_s2 = sld [smem:[#allocation29_spill]]  ;;  %s7227_s21 = scalar_lea.vmem %s341_s26, 48 }
  0x2a   : > { %p7228_p2 = scmp.ne.s32.totalorder %s341_s26, %s7227_s21  ;;  %s7234_s25 = scalar_lea.vmem %s341_s26, 64 }
  0x2b   : > { %p7235_p9 = scmp.lt.s32.totalorder %s341_s26, %s341_s26  ;;  %p7236_p10 = scmp.lt.s32.totalorder %s7234_s25, %s7227_s21 }
  0x2c   : > { %p7230_p5 = pnand %p7228_p2, %p7635_p7 }
  0x2d   : > { %p7237_p11 = por %p7236_p10, %p7235_p9 }
  0x2e   : > { %p7231_p8 = pneg %p7230_p5 }
  0x2f   : > { %7092 = dma.hbm_to_vmem [thread:$0]  (!%p7627_p6), %s8728_s2, 1536, %s327_s22, [#allocation6], %s8712_s13, %s8712_s13, %s7522_s14  }
  0x30   : > { %p7238_p12 = pnand %p7237_p11, %p7231_p8 }
  0x32   : > { %7241 = shalt.err (!%p7238_p12)
}
  0x33   : > { %s8729_s3 = sld [smem:[#allocation30_spill]]  ;;  %s7253_s22 = scalar_lea.vmem %s7631_s29, 48 }
  0x34   : > { %p7254_p13 = scmp.ne.s32.totalorder %s7631_s29, %s7253_s22  ;;  %s7260_s15 = scalar_lea.vmem %s7631_s29, 64 }
  0x35   : > { %p7261_p5 = scmp.lt.s32.totalorder %s7631_s29, %s7631_s29  ;;  %p7262_p8 = scmp.lt.s32.totalorder %s7260_s15, %s7253_s22 }
  0x36   : > { %p7256_p0 = pnand %p7254_p13, %p7635_p7 }
  0x37   : > { %p7263_p9 = por %p7262_p8, %p7261_p5 }
  0x38   : > { %p7257_p2 = pneg %p7256_p0 }
  0x39   : > { %7095 = dma.hbm_to_vmem [thread:$0]  (!%p7627_p6), %s8729_s3, 48, %s341_s26, [#allocation9]  }
  0x3a   : > { %p7264_p10 = pnand %p7263_p9, %p7257_p2 }
  0x3c   : > { %7267 = shalt.err (!%p7264_p10)
}
  0x3d   : > { %s8730_s5 = sld [smem:[#allocation32_spill]]  ;;  %s7523_s26 = smov [#allocation10]  }
  0x3e   : > { %s350_s25 = sshll.u32 %s7523_s26, 4  ;;  %s7524_s28 = smov [#allocation13]   ;;  %s351_s25 = int_to_ptr.vmem [resolvable:$true] %s350_s25 }
  0x3f   : > { %s378_s12 = sshll.u32 %s7524_s28, 4  ;;  %s7279_s13 = scalar_lea.vmem %s351_s25, 1536  ;;  %s379_s12 = int_to_ptr.vmem [resolvable:$true] %s378_s12 }
  0x40   : > { %p7280_p11 = scmp.ne.s32.totalorder %s351_s25, %s7279_s13  ;;  %p7287_p0 = scmp.lt.s32.totalorder %s351_s25, %s351_s25 }
  0x41   : > { %p7288_p2 = scmp.lt.s32.totalorder %s7279_s13, %s7279_s13 }
  0x42   : > { %p7282_p12 = pnand %p7280_p11, %p7635_p7 }
  0x43   : > { %7101 = dma.hbm_to_vmem [thread:$0]  (!%p7627_p6), %s8730_s5, 48, %s7631_s29, [#allocation12]  }
  0x44   : > { %p7283_p13 = pneg %p7282_p12  ;;  %p7289_p5 = por %p7288_p2, %p7287_p0 }
  0x46   : > { %p7290_p8 = pnand %p7289_p5, %p7283_p13 }
  0x48   : > { %7293 = shalt.err (!%p7290_p8)
}
  0x49   : > { %s8731_s22 = smov 384   ;;  %s8732_s4 = sld [smem:[#allocation31_spill]] }
  0x4a   : > { %s7305_s16 = scalar_lea.vmem %s379_s12, 128  ;;  %p7313_p12 = scmp.lt.s32.totalorder %s379_s12, %s379_s12 }
  0x4b   : > { %p7306_p9 = scmp.ne.s32.totalorder %s379_s12, %s7305_s16  ;;  %p7314_p0 = scmp.lt.s32.totalorder %s7305_s16, %s7305_s16 }
  0x4d   : > { %p7308_p10 = pnand %p7306_p9, %p7635_p7  ;;  %p7315_p13 = por %p7314_p0, %p7313_p12 }
  0x4f   : > { %7098 = dma.hbm_to_vmem [thread:$0]  (!%p7627_p6), %s8732_s4, 1536, %s351_s25, [#allocation9], %s8731_s22, %s8731_s22, %s7522_s14  }
  0x50   : > { %p7309_p11 = pneg %p7308_p10 }
  0x52   : > { %p7316_p2 = pnand %p7315_p13, %p7309_p11 }
  0x54   : > { %7319 = shalt.err (!%p7316_p2)
}
  0x55   : > { %s8733_s7 = sld [smem:[#allocation33_spill]]  ;;  %s7525_s26 = smov [#allocation14]  }
  0x56   : > { %s389_s14 = sshll.u32 %s7525_s26, 4  ;;  %s390_s14 = int_to_ptr.vmem [resolvable:$true] %s389_s14 }
  0x57   : > { %s7331_s25 = scalar_lea.vmem %s390_s14, 128  ;;  %p7339_p10 = scmp.lt.s32.totalorder %s390_s14, %s390_s14 }
  0x58   : > { %p7332_p5 = scmp.ne.s32.totalorder %s390_s14, %s7331_s25  ;;  %p7340_p4 = scmp.lt.s32.totalorder %s7331_s25, %s7331_s25 }
  0x5a   : > { %p7334_p8 = pnand %p7332_p5, %p7635_p7  ;;  %p7341_p12 = por %p7340_p4, %p7339_p10 }
  0x5b   : > { %7104 = dma.hbm_to_vmem [thread:$0]  (!%p7627_p6), %s8733_s7, 128, %s379_s12, [#allocation12]  }
  0x5c   : > { %p7335_p9 = pneg %p7334_p8 }
  0x5e   : > { %p7342_p11 = pnand %p7341_p12, %p7335_p9 }
  0x60   : > { %7345 = shalt.err (!%p7342_p11)
}
  0x61   : > { %s8734_s8 = sld [smem:[#allocation34_spill]]  ;;  %s6499_s30 = sadd.s32 4294967294, %s7516_s20  }
  0x62   : > { %s7695_s27 = sadd.s32 1, %s7516_s20   ;;  %s44_s29 = sadd.s32 1, %s7512_s19 }
  0x63   : > { %s41_s12 = ssub.s32 %s7516_s20, %s7695_s27  ;;  %p51_p7 = scmp.ne.s32.totalorder %s7512_s19, %s7508_s18 }
  0x64   : > { %p42_p4 = scmp.eq.s32.totalorder %s41_s12, 0  ;;  %p52_p0 = scmp.eq.s32.totalorder %s7516_s20, 0 }
  0x65   : > { %p57_p13 = scmp.ne.s32.totalorder %s7508_s18, %s7504_s17  ;;  %p275_p5 = scmp.eq.s32.totalorder %s7613_s23, 1 }
  0x66   : > { %s7706_s15 = scalar_select %p42_p4, %s7512_s19, %s44_s29  }
  0x67   : > { %7107 = dma.hbm_to_vmem [thread:$0]  (!%p7627_p6), %s8734_s8, 128, %s390_s14, [#allocation15]  }
  0x68   : > { %8735 = sst [smem:[#allocation28_spill]] %s7706_s15  ;;  %p7708_p2 = por %p52_p0, %p51_p7 }
  0x69   : > { %p7714_p6 = por %p8714_p1, %p57_p13  ;;  %p281_p8 = scmp.eq.s32.totalorder %s6499_s30, 1 }
  0x6a   : > { %p7128_p9 = scmp.lt.s32.totalorder %s7516_s20, 2  ;;  %s403_s21 = sand.u32 1, %s7512_s19  }
  0x6b   : > { %s8737_s13 = scalar_select %p7714_p6, 1, 0 }
  0x6c   : > { %p7721_p10 = por %p275_p5, %p51_p7  ;;  %p7725_p12 = por %p281_p8, %p57_p13 }
  0x6d   : > { %s7729_s25 = sshll.u32 %s403_s21, 3  ;;  %s6509_s28 = sshll.u32 %s7516_s20, 7 }
  0x6e   : > { %s8738_s26 = scalar_select %p7721_p10, 1, 0 }
  0x6f   : > { %s8739_s14 = scalar_select %p7725_p12, 1, 0 }
  0x70   : > { %s7735_s29 = scalar_lea.hbm %s8700_s0, %s6509_s28  ;;  %s407_s30 = scalar_lea.vmem [#allocation2], %s7729_s25 }
  0x71   : > { %s414_s2 = sshll.u32 %s407_s30, 4  ;;  %p7742_p11 = pnand %p7128_p9, %p7708_p2  ;;  %s7738_s2 = int_to_ptr.vmem [resolvable:$true] %s414_s2 }
  0x72   : > { %s7749_s22 = scalar_lea.hbm %s8701_s1, %s6509_s28  ;;  %s421_s12 = sand.u32 1, %s7516_s20  }
  0x73   : > { %s404_s7 = scalar_lea.sflag [#allocation3], %s403_s21  ;;  %s7346_s8 = scalar_lea.hbm %s7735_s29, 128 }
  0x74   : > { %p7347_p4 = scmp.ne.s32.totalorder %s7735_s29, %s7346_s8  ;;  %p7348_p7 = pneg %p7742_p11 }
  0x75   : > { %s7351_s15 = scalar_lea.hbm %s8700_s0, 256  ;;  %p7352_p2 = scmp.lt.s32.totalorder %s7735_s29, %s8700_s0 }
  0x76   : > { %p7349_p0 = pnand %p7348_p7, %p7347_p4  ;;  %p7353_p5 = scmp.lt.s32.totalorder %s7351_s15, %s7346_s8 }
  0x78   : > { %p7350_p13 = pneg %p7349_p0  ;;  %p7354_p8 = por %p7353_p5, %p7352_p2 }
  0x7a   : > { %p7355_p9 = pnand %p7354_p8, %p7350_p13 }
  0x7c   : > { %7358 = shalt.err (!%p7355_p9)
}
  0x7d   : > { %s7359_s5 = scalar_lea.vmem %s7738_s2, 128  ;;  %s7526_s21 = smov [#allocation2]  }
  0x7e   : > { %p7360_p1 = scmp.ne.s32.totalorder %s7738_s2, %s7359_s5  ;;  %s7364_s28 = sshll.u32 %s7526_s21, 4  ;;  %s7365_s28 = int_to_ptr.vmem [resolvable:$false] %s7364_s28 }
  0x7f   : > { %s7366_s16 = scalar_lea.vmem %s7365_s28, 256  ;;  %p7367_p12 = scmp.lt.s32.totalorder %s7738_s2, %s7365_s28 }
  0x80   : > { %p7362_p4 = pnand %p7360_p1, %p7348_p7  ;;  %p7368_p10 = scmp.lt.s32.totalorder %s7366_s16, %s7359_s5 }
  0x82   : > { %p7363_p0 = pneg %p7362_p4  ;;  %p7369_p6 = por %p7368_p10, %p7367_p12 }
  0x84   : > { %p7370_p2 = pnand %p7369_p6, %p7363_p0 }
  0x86   : > { %7373 = shalt.err (!%p7370_p2)
}
  0x87   : > { %7111 = dma.hbm_to_vmem [thread:$0]  (!%p7742_p11), %s7735_s29, 128, %s7738_s2, %s404_s7  }
  0x88   : > { %s425_s8 = scalar_lea.vmem [#allocation5], %s7729_s25  ;;  %s422_s15 = scalar_lea.sflag [#allocation6], %s421_s12 }
  0x89   : > { %s432_s19 = sshll.u32 %s425_s8, 4  ;;  %s7374_s30 = scalar_lea.hbm %s7749_s22, 128  ;;  %s433_s19 = int_to_ptr.vmem [resolvable:$true] %s432_s19 }
  0x8a   : > { %p7375_p1 = scmp.ne.s32.totalorder %s7749_s22, %s7374_s30  ;;  %s7379_s21 = scalar_lea.hbm %s8701_s1, 256 }
  0x8b   : > { %p7380_p12 = scmp.lt.s32.totalorder %s7749_s22, %s8701_s1  ;;  %p7381_p13 = scmp.lt.s32.totalorder %s7379_s21, %s7374_s30 }
  0x8c   : > { %p7377_p6 = pnand %p7375_p1, %p7348_p7 }
  0x8d   : > { %p7382_p5 = por %p7381_p13, %p7380_p12 }
  0x8e   : > { %p7378_p10 = pneg %p7377_p6 }
  0x90   : > { %p7383_p8 = pnand %p7382_p5, %p7378_p10 }
  0x92   : > { %7386 = shalt.err (!%p7383_p8)
}
  0x93   : > { %s7387_s2 = scalar_lea.vmem %s433_s19, 128  ;;  %s7527_s7 = smov [#allocation5]  }
  0x94   : > { %p7388_p9 = scmp.ne.s32.totalorder %s433_s19, %s7387_s2  ;;  %s7392_s25 = sshll.u32 %s7527_s7, 4  ;;  %s7393_s25 = int_to_ptr.vmem [resolvable:$false] %s7392_s25 }
  0x95   : > { %s7394_s29 = scalar_lea.vmem %s7393_s25, 256  ;;  %p7395_p2 = scmp.lt.s32.totalorder %s433_s19, %s7393_s25 }
  0x96   : > { %p7390_p4 = pnand %p7388_p9, %p7348_p7  ;;  %p7396_p1 = scmp.lt.s32.totalorder %s7394_s29, %s7387_s2 }
  0x98   : > { %p7391_p0 = pneg %p7390_p4  ;;  %p7397_p6 = por %p7396_p1, %p7395_p2 }
  0x9a   : > { %p7398_p3 = pnand %p7397_p6, %p7391_p0 }
  0x9c   : > { %7401 = shalt.err (!%p7398_p3)
}
  0x9d   : > { %7114 = dma.hbm_to_vmem [thread:$0]  (!%p7742_p11), %s7749_s22, 128, %s433_s19, %s422_s15  }
  0x9e   : > { %p8741_p10 = scmp.ne.s32.totalorder %s8725_s24, 0 }
  0x9f   : > { %s7800_s12 = sand.u32 (!%p8741_p10), 1, %s7508_s18   ;;  %p8742_p7 = scmp.ne.s32.totalorder (!%p8741_p10), %s8737_s13, 0 }
  0xa0   : > { %441 = sbr.rel (%p8741_p10) target bundleno = 1135 (0x46f), region = 60  ;;  %s7803_s8 = sshll.u32 (!%p8741_p10), %s7800_s12, 3 }
  0xa1   : > { %s444_s30 = scalar_lea.sflag (!%p8741_p10), [#allocation3], %s7800_s12  ;;  %s447_s4 = scalar_lea.vmem (!%p8741_p10), [#allocation2], %s7803_s8 }
  0xa5   : > { %7471 = dma.done.wait (%p8742_p7), %s444_s30, 128  }
  0xa6   : > { %7473 = vsyncadd (%p8742_p7), %s444_s30, 4294967168  ;;  %s452_s3 = sand.u32 1, %s7613_s23   ;;  %s456_s22 = scalar_lea.vmem [#allocation5], %s7803_s8 }
  0xa7   : > { %s453_s24 = scalar_lea.sflag [#allocation6], %s452_s3 }
  0xa8   : > { %7475 = dma.done.wait (%p8742_p7), %s453_s24, 128  }
  0xa9   : > { %7477 = vsyncadd (%p8742_p7), %s453_s24, 4294967168  ;;  %p8743_p3 = scmp.eq.s32.totalorder %s7613_s23, 0 }
  0xab   : > { %7479 = dma.done.wait (%p8743_p3), [#allocation6], 1536   ;;  %p8744_p11 = pmov %p8743_p3 }
  0xac   : > { %p8745_p12 = pmov %p8743_p3 }
  0xad   : > { %7481 = vsyncadd (%p8744_p11), [#allocation6], 4294965760 }
  0xae   : > { %7483 = dma.done.wait (%p8745_p12), [#allocation9], 1584   ;;  %p8746_p13 = pmov %p8743_p3 }
  0xaf   : > { %p8747_p5 = pmov %p8743_p3 }
  0xb0   : > { %7485 = vsyncadd (%p8746_p13), [#allocation9], 4294965712 }
  0xb1   : > { %7487 = dma.done.wait (%p8747_p5), [#allocation12], 176   ;;  %p8748_p8 = pmov %p8743_p3 }
  0xb2   : > { %p8749_p9 = pmov %p8743_p3 }
  0xb3   : > { %7489 = vsyncadd (%p8748_p8), [#allocation12], 4294967120 }
  0xb4   : > { %7491 = dma.done.wait (%p8749_p9), [#allocation15], 128   ;;  %p8750_p4 = pmov %p8743_p3 }
  0xb5   : > { %v7528_v0 = vmov 0.0   ;;  %v540_v1 = vld [vmem:[#allocation7 + $0x50] sm:$0xff]  ;;  %v539_v2 = vld [vmem:[#allocation7 + $0x48] sm:$0xff]  ;;  %v537_v3 = vld [vmem:[#allocation7 + $0x38] sm:$0xff]  ;;  %vm559_vm0 = vcmask 261120   ;;  %vm7529_vm1 = vmmov 0  }
  0xb6   : > { %7493 = vsyncadd (%p8750_p4), [#allocation15], 4294967168  ;;  %635 = vmatprep.mubr.f32.mxu0 %v7528_v0  ;;  %751 = vmatprep.mubr.f32.mxu1 %v7528_v0  ;;  %v7835_v4 = vand.u32 4294901760, %v540_v1  ;;  %v7837_v5 = vand.u32 4294901760, %v539_v2  ;;  %v7839_v6 = vand.u32 4294901760, %v537_v3  ;;  %v536_v7 = vld [vmem:[#allocation7 + $0x30] sm:$0xff] }
  0xb7   : > { %v534_v8 = vld [vmem:[#allocation7 + $0x20] sm:$0xff]  ;;  %v533_v9 = vld [vmem:[#allocation7 + $0x18] sm:$0xff]  ;;  %v7841_v10 = vand.u32 4294901760, %v536_v7  ;;  %v531_v13 = vld [vmem:[#allocation7 + $0x8] sm:$0xff]  ;;  %vm4440_vm2 = vcmask 64512   ;;  %s6525_s21 = sshll.u32 %s7613_s23, 7 }
  0xb8   : > { %v7843_v11 = vand.u32 4294901760, %v534_v8  ;;  %v7845_v12 = vand.u32 4294901760, %v533_v9  ;;  %v530_v14 = vld [vmem:[#allocation7] sm:$0xff]  ;;  %588 = vmatprep.subr.mxu0 %v7835_v4  ;;  %v7850_v16 = vand.u32 4294901760, %v531_v13  ;;  %v7853_v17 = vsub.f32 %v540_v1, %v7835_v4  ;;  %v541_v56 = vld [vmem:[#allocation7 + $0x58] sm:$0xff]  ;;  %v535_v59 = vld [vmem:[#allocation7 + $0x28] sm:$0xff]  ;;  %s8637_s25 = scalar_lea.hbm %s8710_s10, %s6525_s21 }
  0xb9   : > { %v529_v15 = vld [vmem:[%s447_s4] sm:$0xff]  ;;  %v7856_v18 = vsub.f32 %v539_v2, %v7837_v5  ;;  %590 = vmatpush1.msra.mxu0 %v7837_v5  ;;  %v7860_v19 = vsub.f32 %v537_v3, %v7839_v6  ;;  %v7864_v21 = vsub.f32 %v536_v7, %v7841_v10  ;;  %v7868_v23 = vand.u32 4294901760, %v530_v14  ;;  %v532_v61 = vld [vmem:[#allocation7 + $0x10] sm:$0xff]  ;;  %s521_s28 = scalar_lea.vmem [#allocation16], %s7803_s8  ;;  %s6286_s29 = scalar_lea.sflag [#allocation4], %s7800_s12 }
  0xba   : > { %v561_v20 = vsel %vm559_vm0, %v529_v15, 0  ;;  %592 = vmatprep.subr.mxu0 %v7839_v6  ;;  %v673_v22 = vand.u32 4294901760, %v7853_v17  ;;  %v7877_v28 = vsub.f32 %v534_v8, %v7843_v11  ;;  %v7880_v29 = vsub.f32 %v533_v9, %v7845_v12  ;;  %v538_v57 = vld [vmem:[#allocation7 + $0x40] sm:$0xff]  ;;  %s6304_s16 = sshll.u32 %s521_s28, 4  ;;  %p8751_p2 = scmp.ne.s32.totalorder %s8738_s26, 0  ;;  %s8639_s16 = int_to_ptr.vmem [resolvable:$true] %s6304_s16 }
  0xbb   : > { %v679_v24 = vand.u32 4294901760, %v7856_v18  ;;  %v7871_v25 = vand.u32 4294901760, %v561_v20  ;;  %594 = vmatpush1.msra.mxu0 %v7841_v10  ;;  %v685_v26 = vand.u32 4294901760, %v7860_v19  ;;  %v691_v27 = vand.u32 4294901760, %v7864_v21  ;;  %s7402_s30 = scalar_lea.vmem %s8639_s16, 128  ;;  %s7530_s4 = smov [#allocation16]  }
  0xbc   : > { %596 = vmatprep.subr.mxu0 %v7843_v11  ;;  %v674_v30 = vsub.f32 %v7853_v17, %v673_v22  ;;  %v7893_v33 = vsub.f32 %v531_v13, %v7850_v16  ;;  %v697_v36 = vand.u32 4294901760, %v7877_v28  ;;  %v703_v37 = vand.u32 4294901760, %v7880_v29  ;;  %p7403_p0 = scmp.ne.s32.totalorder %s8639_s16, %s7402_s30  ;;  %s7406_s3 = sshll.u32 %s7530_s4, 4  ;;  %s7407_s3 = int_to_ptr.vmem [resolvable:$false] %s7406_s3 }
  0xbd   : > { %v680_v31 = vsub.f32 %v7856_v18, %v679_v24  ;;  %v7890_v32 = vsub.f32 %v561_v20, %v7871_v25  ;;  %598 = vmatpush1.msra.mxu0 %v7845_v12  ;;  %v686_v34 = vsub.f32 %v7860_v19, %v685_v26  ;;  %v692_v35 = vsub.f32 %v7864_v21, %v691_v27  ;;  %v1599_v20 = vld [vmem:[#allocation10 + $0x38] sm:$0xff]  ;;  %s7408_s24 = scalar_lea.vmem %s7407_s3, 256  ;;  %p7409_p10 = scmp.lt.s32.totalorder %s8639_s16, %s7407_s3 }
  0xbe   : > { %600 = vmatprep.subr.mxu0 %v7850_v16  ;;  %v675_v38 = vand.u32 4294901760, %v674_v30  ;;  %v709_v41 = vand.u32 4294901760, %v7893_v33  ;;  %v698_v44 = vsub.f32 %v7877_v28, %v697_v36  ;;  %v704_v45 = vsub.f32 %v7880_v29, %v703_v37  ;;  %p7404_p1 = pnand %p7403_p0, %p8751_p2  ;;  %p7410_p7 = scmp.lt.s32.totalorder %s7408_s24, %s7402_s30 }
  0xbf   : > { %v681_v39 = vand.u32 4294901760, %v680_v31  ;;  %v7906_v40 = vand.u32 4294901760, %v7890_v32  ;;  %602 = vmatpush1.msra.mxu0 %v7868_v23  ;;  %v687_v42 = vand.u32 4294901760, %v686_v34  ;;  %v693_v43 = vand.u32 4294901760, %v692_v35  ;;  %v1593_v31 = vld [vmem:[#allocation10 + $0x8] sm:$0xff]  ;;  %v1592_v35 = vld [vmem:[#allocation10] sm:$0xff] }
  0xc0   : > { %676 = vmatprep.subr.mxu1 %v675_v38  ;;  %785 = vmatprep.subr.mxu0 %v7853_v17  ;;  %v710_v47 = vsub.f32 %v7893_v33, %v709_v41  ;;  %v714_v48 = vsub.f32 %v530_v14, %v7868_v23  ;;  %v699_v49 = vand.u32 4294901760, %v698_v44  ;;  %v705_v50 = vand.u32 4294901760, %v704_v45  ;;  %v1591_v17 = vld [vmem:[%s456_s22] sm:$0xff]  ;;  %p7405_p6 = pneg %p7404_p1  ;;  %p7411_p3 = por %p7410_p7, %p7409_p10 }
  0xc1   : > { %v639_v46 = vsub.f32 %v7890_v32, %v7906_v40  ;;  %682 = vmatpush1.msra.mxu1 %v681_v39  ;;  %v7932_v58 = vand.u32 4294901760, %v541_v56  ;;  %v7939_v60 = vand.u32 4294901760, %v538_v57  ;;  %v7950_v63 = vand.u32 4294901760, %v535_v59 }
  0xc2   : > { %688 = vmatprep.subr.mxu1 %v687_v42  ;;  %v711_v52 = vand.u32 4294901760, %v710_v47  ;;  %v715_v53 = vand.u32 4294901760, %v714_v48  ;;  %v7959_v2 = vand.u32 4294901760, %v532_v61  ;;  %p7412_p11 = pnand %p7411_p3, %p7405_p6 }
  0xc3   : > { %v7919_v51 = vand.u32 4294901760, %v639_v46  ;;  %694 = vmatpush1.msra.mxu1 %v693_v43  ;;  %v7948_v62 = vsub.f32 %v541_v56, %v7932_v58  ;;  %v7957_v1 = vsub.f32 %v538_v57, %v7939_v60  ;;  %v7966_v3 = vsub.f32 %v535_v59, %v7950_v63 }
  0xc4   : > { %700 = vmatprep.subr.mxu1 %v699_v49  ;;  %v716_v54 = vsub.f32 %v714_v48, %v715_v53  ;;  %v7973_v8 = vsub.f32 %v532_v61, %v7959_v2 }
  0xc5   : > { %641 = vmatmul.mubr.f32.vlgmr.msra.gmra.mxu0 %v7919_v51  ;;  %706 = vmatpush1.msra.mxu1 %v705_v50  ;;  %v1212_v7 = vand.u32 4294901760, %v7948_v62  ;;  %v1219_v9 = vand.u32 4294901760, %v7957_v1  ;;  %v1226_v13 = vand.u32 4294901760, %v7966_v3 }
  0xc6   : > { %788 = vmatpush1.msra.mxu0 %v7856_v18  ;;  %712 = vmatprep.subr.mxu1 %v711_v52  ;;  %v717_v55 = vand.u32 4294901760, %v716_v54  ;;  %v1602_v18 = vld [vmem:[#allocation10 + $0x50] sm:$0xff] }
  0xc7   : > { %791 = vmatprep.subr.mxu0 %v7860_v19  ;;  %839 = vmatprep.mubr.f32.mxu0 %v7528_v0  ;;  %v1601_v19 = vld [vmem:[#allocation10 + $0x48] sm:$0xff] }
  0xc8   : > { %794 = vmatpush1.msra.mxu0 %v7864_v21  ;;  %718 = vmatpush1.msra.mxu1 %v717_v55  ;;  %v1622_v21 = vsel %vm559_vm0, %v1591_v17, 0 }
  0xc9   : > { %797 = vmatprep.subr.mxu0 %v7877_v28  ;;  %753 = vmatmul.mubr.f32.vlgmr.msra.gmra.mxu1 %v7871_v25  ;;  %v1595_v28 = vld [vmem:[#allocation10 + $0x18] sm:$0xff] }
  0xca   : > { %800 = vmatpush1.msra.mxu0 %v7880_v29  ;;  %873 = vmatprep.subr.mxu1 %v7835_v4  ;;  %v8040_v29 = vand.u32 4294901760, %v1622_v21 }
  0xcb   : > { %803 = vmatprep.subr.mxu0 %v7893_v33  ;;  %875 = vmatpush1.msra.mxu1 %v7837_v5 }
  0xcc   : > { %806 = vmatpush1.msra.mxu0 %v714_v48  ;;  %877 = vmatprep.subr.mxu1 %v7839_v6  ;;  %v8077_v42 = vsub.f32 %v1622_v21, %v8040_v29 }
  0xcd   : > { %842 = vmatmul.mubr.f32.vlgmr.msra.gmra.mxu0 %v7890_v32  ;;  %957 = vmatprep.subr.mxu0 %v673_v22  ;;  %v8029_v22 = vand.u32 4294901760, %v1602_v18 }
  0xce   : > { %879 = vmatpush1.msra.mxu1 %v7841_v10  ;;  %961 = vmatpush1.msra.mxu0 %v679_v24  ;;  %v8034_v24 = vand.u32 4294901760, %v1601_v19  ;;  %v8107_v49 = vand.u32 4294901760, %v8077_v42 }
  0xcf   : > { %881 = vmatprep.subr.mxu1 %v7843_v11  ;;  %965 = vmatprep.subr.mxu0 %v685_v26  ;;  %v1596_v26 = vld [vmem:[#allocation10 + $0x20] sm:$0xff]  ;;  %v8052_v34 = vsub.f32 %v1602_v18, %v8029_v22 }
  0xd0   : > { %883 = vmatpush1.msra.mxu1 %v7845_v12  ;;  %969 = vmatpush1.msra.mxu0 %v691_v27  ;;  %v8038_v27 = vand.u32 4294901760, %v1599_v20  ;;  %v8049_v33 = vand.u32 4294901760, %v1596_v26  ;;  %v1700_v57 = vsub.f32 %v8077_v42, %v8107_v49 }
  0xd1   : > { %885 = vmatprep.subr.mxu1 %v7850_v16  ;;  %973 = vmatprep.subr.mxu0 %v697_v36  ;;  %v8059_v36 = vand.u32 4294901760, %v1595_v28  ;;  %v1734_v43 = vand.u32 4294901760, %v8052_v34 }
  0xd2   : > { %887 = vmatpush1.msra.mxu1 %v7868_v23  ;;  %920 = vmatprep.mubr.f32.mxu1 %v7528_v0  ;;  %v8067_v38 = vsub.f32 %v1599_v20, %v8038_v27  ;;  %v8085_v44 = vsub.f32 %v1596_v26, %v8049_v33 }
  0xd3   : > { %977 = vmatpush1.msra.mxu0 %v703_v37  ;;  %924 = vmatmul.mubr.f32.vlgmr.msra.gmra.mxu1 %v7906_v40  ;;  %v8064_v37 = vand.u32 4294901760, %v1593_v31  ;;  %v8090_v45 = vsub.f32 %v1595_v28, %v8059_v36 }
  0xd4   : > { %981 = vmatprep.subr.mxu0 %v709_v41  ;;  %1051 = vmatprep.subr.mxu1 %v7835_v4  ;;  %v1213_v4 = vsub.f32 %v7948_v62, %v1212_v7  ;;  %v8074_v41 = vand.u32 4294901760, %v1592_v35  ;;  %v1746_v47 = vand.u32 4294901760, %v8067_v38  ;;  %v1758_v52 = vand.u32 4294901760, %v8085_v44 }
  0xd5   : > { %985 = vmatpush1.msra.mxu0 %v715_v53  ;;  %1018 = vmatprep.mubr.f32.mxu0 %v7528_v0  ;;  %v8098_v48 = vsub.f32 %v1593_v31, %v8064_v37  ;;  %v1764_v54 = vand.u32 4294901760, %v8090_v45 }
  0xd6   : > { %1053 = vmatpush1.msra.mxu1 %v7837_v5  ;;  %1020 = vmatmul.mubr.f32.vlgmr.msra.gmra.mxu0 %v7871_v25  ;;  %v1220_v5 = vsub.f32 %v7957_v1, %v1219_v9  ;;  %v1747_v55 = vsub.f32 %v8067_v38, %v1746_v47  ;;  %v1759_v61 = vsub.f32 %v8085_v44, %v1758_v52 }
  0xd7   : > { %1055 = vmatprep.subr.mxu1 %v7839_v6  ;;  %6685 = vmatprep.subr.mxu0 %v7528_v0  ;;  %v1233_v6 = vand.u32 4294901760, %v7973_v8  ;;  %v1770_v56 = vand.u32 4294901760, %v8098_v48 }
  0xd8   : > { %1057 = vmatpush1.msra.mxu1 %v7841_v10  ;;  %6686 = vmatpush3.msra.mxu0 %v7932_v58  ;;  %v1214_v10 = vand.u32 4294901760, %v1213_v4 }
  0xd9   : > { %1059 = vmatprep.subr.mxu1 %v7843_v11  ;;  %6687 = vmatprep.subr.mxu0 %v7528_v0  ;;  %v1227_v11 = vsub.f32 %v7966_v3, %v1226_v13  ;;  %v1234_v14 = vsub.f32 %v7973_v8, %v1233_v6 }
  0xda   : > { %1061 = vmatpush1.msra.mxu1 %v7845_v12  ;;  %6688 = vmatpush3.msra.mxu0 %v7939_v60  ;;  %v1221_v12 = vand.u32 4294901760, %v1220_v5  ;;  %v1603_v5 = vld [vmem:[#allocation10 + $0x58] sm:$0xff] }
  0xdb   : > { %1063 = vmatprep.subr.mxu1 %v7850_v16  ;;  %6689 = vmatprep.subr.mxu0 %v7528_v0  ;;  %v1228_v15 = vand.u32 4294901760, %v1227_v11  ;;  %v1235_v16 = vand.u32 4294901760, %v1234_v14  ;;  %v1597_v14 = vld [vmem:[#allocation10 + $0x28] sm:$0xff] }
  0xdc   : > { %1065 = vmatpush1.msra.mxu1 %v7868_v23  ;;  %1098 = vmatprep.mubr.f32.mxu1 %v7528_v0  ;;  %v1598_v23 = vld [vmem:[#allocation10 + $0x30] sm:$0xff] }
  0xdd   : > { %6690 = vmatpush3.msra.mxu0 %v7950_v63  ;;  %1100 = vmatmul.mubr.f32.vlgmr.msra.gmra.mxu1 %v7871_v25  ;;  %v8044_v30 = vand.u32 4294901760, %v1598_v23 }
  0xde   : > { %6691 = vmatprep.subr.mxu0 %v7528_v0  ;;  %6696 = vmatprep.subr.mxu1 %v7528_v0 }
  0xdf   : > { %6692 = vmatpush3.msra.mxu0 %v7959_v2  ;;  %6697 = vmatpush3.msra.mxu1 %v1214_v10  ;;  %v8072_v39 = vsub.f32 %v1598_v23, %v8044_v30  ;;  %v1600_v10 = vld [vmem:[#allocation10 + $0x40] sm:$0xff] }
  0xe0   : > { %6693 = vmatprep.mubr.msk.f32.mxu0 %vm7529_vm1, %v7528_v0  ;;  %6698 = vmatprep.subr.mxu1 %v7528_v0 }
  0xe1   : > { %6707 = vmatprep.subr.mxu0 %v7528_v0  ;;  %6694 = vmatmul.mubr.f32.vlgmr.msra.gmra.mxu0 %v7919_v51  ;;  %v1752_v50 = vand.u32 4294901760, %v8072_v39  ;;  %v1735_v51 = vsub.f32 %v8052_v34, %v1734_v43 }
  0xe2   : > { %6699 = vmatpush3.msra.mxu1 %v1221_v12  ;;  %6708 = vmatpush3.msra.mxu0 %v7948_v62  ;;  %v8194_v12 = vand.u32 4294901760, %v1600_v10 }
  0xe3   : > { %6700 = vmatprep.subr.mxu1 %v7528_v0  ;;  %6709 = vmatprep.subr.mxu0 %v7528_v0 }
  0xe4   : > { %6701 = vmatpush3.msra.mxu1 %v1228_v15  ;;  %6710 = vmatpush3.msra.mxu0 %v7957_v1  ;;  %v1748_v1 = vand.u32 4294901760, %v1747_v55  ;;  %v8205_v15 = vand.u32 4294901760, %v1597_v14  ;;  %v8212_v18 = vsub.f32 %v1600_v10, %v8194_v12 }
  0xe5   : > { %6702 = vmatprep.subr.mxu1 %v7528_v0  ;;  %6711 = vmatprep.subr.mxu0 %v7528_v0 }
  0xe6   : > { %6703 = vmatpush3.msra.mxu1 %v1235_v16  ;;  %6704 = vmatprep.mubr.msk.f32.mxu1 %vm7529_vm1, %v7528_v0  ;;  %v1594_v16 = vld [vmem:[#allocation10 + $0x10] sm:$0xff]  ;;  %v2286_v20 = vsub.f32 %v1597_v14, %v8205_v15 }
  0xe7   : > { %6712 = vmatpush3.msra.mxu0 %v7966_v3  ;;  %6705 = vmatmul.mubr.f32.vlgmr.msra.gmra.mxu1 %v7871_v25  ;;  %v1771_v3 = vsub.f32 %v8098_v48, %v1770_v56 }
  0xe8   : > { %6713 = vmatprep.subr.mxu0 %v7528_v0  ;;  %6718 = vmatprep.subr.mxu1 %v7528_v0 }
  0xe9   : > { %6714 = vmatpush3.msra.mxu0 %v7973_v8  ;;  %6719 = vmatpush3.msra.mxu1 %v7932_v58 }
  0xea   : > { %6715 = vmatprep.mubr.msk.f32.mxu0 %vm7529_vm1, %v7528_v0  ;;  %6720 = vmatprep.subr.mxu1 %v7528_v0 }
  0xeb   : > { %6729 = vmatprep.subr.mxu0 %v7528_v0  ;;  %6716 = vmatmul.mubr.f32.vlgmr.msra.gmra.mxu0 %v7890_v32  ;;  %v8057_v32 = vsub.f32 %v1601_v19, %v8034_v24  ;;  %v8216_v19 = vand.u32 4294901760, %v1594_v16 }
  0xec   : > { %6721 = vmatpush3.msra.mxu1 %v7939_v60  ;;  %6730 = vmatpush3.msra.mxu0 %v1212_v7 }
  0xed   : > { %6722 = vmatprep.subr.mxu1 %v7528_v0  ;;  %6731 = vmatprep.subr.mxu0 %v7528_v0  ;;  %v1740_v46 = vand.u32 4294901760, %v8057_v32  ;;  %v2293_v23 = vsub.f32 %v1594_v16, %v8216_v19 }
  0xee   : > { %6723 = vmatpush3.msra.mxu1 %v7950_v63  ;;  %6732 = vmatpush3.msra.mxu0 %v1219_v9  ;;  %v1760_v9 = vand.u32 4294901760, %v1759_v61 }
  0xef   : > { %6724 = vmatprep.subr.mxu1 %v7528_v0  ;;  %6733 = vmatprep.subr.mxu0 %v7528_v0  ;;  %v1741_v53 = vsub.f32 %v8057_v32, %v1740_v46 }
  0xf0   : > { %6725 = vmatpush3.msra.mxu1 %v7959_v2  ;;  %6726 = vmatprep.mubr.msk.f32.mxu1 %vm7529_vm1, %v7528_v0 }
  0xf1   : > { %6734 = vmatpush3.msra.mxu0 %v1226_v13  ;;  %6727 = vmatmul.mubr.f32.vlgmr.msra.gmra.mxu1 %v7906_v40  ;;  %v8104_v40 = vsub.f32 %v1592_v35, %v8074_v41  ;;  %v1742_v62 = vand.u32 4294901760, %v1741_v53 }
  0xf2   : > { %6735 = vmatprep.subr.mxu0 %v7528_v0  ;;  %6740 = vmatprep.subr.mxu1 %v7528_v0 }
  0xf3   : > { %6736 = vmatpush3.msra.mxu0 %v1233_v6  ;;  %6737 = vmatprep.mubr.msk.f32.mxu0 %vm7529_vm1, %v7528_v0  ;;  %v1776_v59 = vand.u32 4294901760, %v8104_v40  ;;  %v8177_v6 = vand.u32 4294901760, %v1603_v5 }
  0xf4   : > { %6741 = vmatpush3.msra.mxu1 %v7932_v58  ;;  %6738 = vmatmul.mubr.f32.vlgmr.msra.gmra.mxu0 %v7871_v25  ;;  %v1753_v58 = vsub.f32 %v8072_v39, %v1752_v50 }
  0xf5   : > { %6742 = vmatprep.subr.mxu1 %v7528_v0  ;;  %1649 = vmatprep.subr.mxu0 %v8029_v22  ;;  %v1777_v8 = vsub.f32 %v8104_v40, %v1776_v59  ;;  %v8189_v11 = vsub.f32 %v1603_v5, %v8177_v6 }
  0xf6   : > { %6743 = vmatpush3.msra.mxu1 %v7939_v60  ;;  %1651 = vmatpush1.msra.mxu0 %v8034_v24  ;;  %v1736_v60 = vand.u32 4294901760, %v1735_v51  ;;  %v1754_v7 = vand.u32 4294901760, %v1753_v58 }
  0xf7   : > { %6744 = vmatprep.subr.mxu1 %v7528_v0  ;;  %1653 = vmatprep.subr.mxu0 %v8038_v27  ;;  %v1778_v13 = vand.u32 4294901760, %v1777_v8  ;;  %v2273_v17 = vand.u32 4294901760, %v8189_v11 }
  0xf8   : > { %6745 = vmatpush3.msra.mxu1 %v7950_v63  ;;  %1655 = vmatpush1.msra.mxu0 %v8044_v30  ;;  %v1765_v63 = vsub.f32 %v8090_v45, %v1764_v54 }
  0xf9   : > { %6746 = vmatprep.subr.mxu1 %v7528_v0  ;;  %1657 = vmatprep.subr.mxu0 %v8049_v33  ;;  %v2274_v21 = vsub.f32 %v8189_v11, %v2273_v17 }
  0xfa   : > { %6747 = vmatpush3.msra.mxu1 %v7959_v2  ;;  %6748 = vmatprep.mubr.msk.f32.mxu1 %vm7529_vm1, %v7528_v0  ;;  %v8154_v2 = vand.u32 4294901760, %v1700_v57  ;;  %v1766_v4 = vand.u32 4294901760, %v1765_v63 }
  0xfb   : > { %1659 = vmatpush1.msra.mxu0 %v8059_v36  ;;  %6749 = vmatmul.mubr.f32.vlgmr.msra.gmra.mxu1 %v7871_v25  ;;  %v1772_v25 = vand.u32 4294901760, %v1771_v3  ;;  %v2275_v26 = vand.u32 4294901760, %v2274_v21 }
  0xfc   : > { %1661 = vmatprep.subr.mxu0 %v8064_v37  ;;  %1737 = vmatprep.subr.mxu1 %v1736_v60 }
  0xfd   : > { %1663 = vmatpush1.msra.mxu0 %v8074_v41  ;;  %1743 = vmatpush1.msra.mxu1 %v1742_v62 }
  0xfe   : > { %1696 = vmatprep.mubr.f32.mxu0 %v7528_v0  ;;  %1749 = vmatprep.subr.mxu1 %v1748_v1 }
  0xff   : > { %1846 = vmatprep.subr.mxu0 %v8052_v34  ;;  %1702 = vmatmul.mubr.f32.vlgmr.msra.gmra.mxu0 %v8154_v2 }
 0x100   : > { %1755 = vmatpush1.msra.mxu1 %v1754_v7  ;;  %1849 = vmatpush1.msra.mxu0 %v8057_v32  ;;  %v544_v32 = vlaneseq }
 0x101   : > { %1761 = vmatprep.subr.mxu1 %v1760_v9  ;;  %1852 = vmatprep.subr.mxu0 %v8067_v38  ;;  %v542_v38 = vld [vmem:[#allocation8] sm:$0x7] }
 0x102   : > { %1767 = vmatpush1.msra.mxu1 %v1766_v4  ;;  %1855 = vmatpush1.msra.mxu0 %v8072_v39 }
 0x103   : > { %1773 = vmatprep.subr.mxu1 %v1772_v25  ;;  %1858 = vmatprep.subr.mxu0 %v8085_v44 }
 0x104   : > { %1779 = vmatpush1.msra.mxu1 %v1778_v13  ;;  %1812 = vmatprep.mubr.f32.mxu1 %v7528_v0 }
 0x105   : > { %1861 = vmatpush1.msra.mxu0 %v8090_v45  ;;  %1814 = vmatmul.mubr.f32.vlgmr.msra.gmra.mxu1 %v8040_v29 }
 0x106   : > { %1864 = vmatprep.subr.mxu0 %v8098_v48  ;;  %1934 = vmatprep.subr.mxu1 %v8029_v22 }
 0x107   : > { %1867 = vmatpush1.msra.mxu0 %v8104_v40  ;;  %1900 = vmatprep.mubr.f32.mxu0 %v7528_v0 }
 0x108   : > { %1936 = vmatpush1.msra.mxu1 %v8034_v24  ;;  %1903 = vmatmul.mubr.f32.vlgmr.msra.gmra.mxu0 %v8077_v42 }
 0x109   : > { %1938 = vmatprep.subr.mxu1 %v8038_v27  ;;  %2018 = vmatprep.subr.mxu0 %v1734_v43 }
 0x10a   : > { %1940 = vmatpush1.msra.mxu1 %v8044_v30  ;;  %2022 = vmatpush1.msra.mxu0 %v1740_v46 }
 0x10b   : > { %1942 = vmatprep.subr.mxu1 %v8049_v33  ;;  %2026 = vmatprep.subr.mxu0 %v1746_v47 }
 0x10c   : > { %1944 = vmatpush1.msra.mxu1 %v8059_v36  ;;  %2030 = vmatpush1.msra.mxu0 %v1752_v50 }
 0x10d   : > { %1946 = vmatprep.subr.mxu1 %v8064_v37  ;;  %2034 = vmatprep.subr.mxu0 %v1758_v52 }
 0x10e   : > { %1948 = vmatpush1.msra.mxu1 %v8074_v41  ;;  %1981 = vmatprep.mubr.f32.mxu1 %v7528_v0 }
 0x10f   : > { %2038 = vmatpush1.msra.mxu0 %v1764_v54  ;;  %1985 = vmatmul.mubr.f32.vlgmr.msra.gmra.mxu1 %v8107_v49 }
 0x110   : > { %2042 = vmatprep.subr.mxu0 %v1770_v56  ;;  %2112 = vmatprep.subr.mxu1 %v8029_v22  ;;  %v2280_v22 = vand.u32 4294901760, %v8212_v18 }
 0x111   : > { %2046 = vmatpush1.msra.mxu0 %v1776_v59  ;;  %2079 = vmatprep.mubr.f32.mxu0 %v7528_v0 }
 0x112   : > { %2114 = vmatpush1.msra.mxu1 %v8034_v24  ;;  %2081 = vmatmul.mubr.f32.vlgmr.msra.gmra.mxu0 %v8040_v29  ;;  %v2281_v24 = vsub.f32 %v8212_v18, %v2280_v22 }
 0x113   : > { %2116 = vmatprep.subr.mxu1 %v8038_v27  ;;  %2159 = vmatprep.mubr.f32.mxu1 %v7528_v0  ;;  %v2287_v27 = vand.u32 4294901760, %v2286_v20 }
 0x114   : > { %2118 = vmatpush1.msra.mxu1 %v8044_v30  ;;  %6751 = vmatprep.subr.mxu0 %v7528_v0  ;;  %v2294_v30 = vand.u32 4294901760, %v2293_v23  ;;  %v2282_v31 = vand.u32 4294901760, %v2281_v24 }
 0x115   : > { %2120 = vmatprep.subr.mxu1 %v8049_v33  ;;  %6752 = vmatpush3.msra.mxu0 %v8177_v6  ;;  %v2288_v28 = vsub.f32 %v2286_v20, %v2287_v27 }
 0x116   : > { %2122 = vmatpush1.msra.mxu1 %v8059_v36  ;;  %6753 = vmatprep.subr.mxu0 %v7528_v0  ;;  %v2295_v33 = vsub.f32 %v2293_v23, %v2294_v30  ;;  %v8294_v36 = vshrl.u32 %v544_v32, 7 }
 0x117   : > { %2124 = vmatprep.subr.mxu1 %v8064_v37  ;;  %6754 = vmatpush3.msra.mxu0 %v8194_v12  ;;  %v2289_v34 = vand.u32 4294901760, %v2288_v28 }
 0x118   : > { %2126 = vmatpush1.msra.mxu1 %v8074_v41  ;;  %6755 = vmatprep.subr.mxu0 %v7528_v0  ;;  %v2296_v35 = vand.u32 4294901760, %v2295_v33  ;;  %v546_v37 = vsub.s32 0, %v8294_v36  ;;  %v550_v39 = vsub.s32 1, %v8294_v36  ;;  %v554_v60 = vsub.s32 2, %v8294_v36 }
 0x119   : > { %2161 = vmatmul.mubr.f32.vlgmr.msra.gmra.mxu1 %v8040_v29  ;;  %6756 = vmatpush3.msra.mxu0 %v8205_v15 }
 0x11a   : > { %6759 = vmatprep.mubr.msk.f32.mxu0 %vm7529_vm1, %v7528_v0  ;;  %6757 = vmatprep.subr.mxu0 %v7528_v0  ;;  %v555_v7 = vrot.slane %v542_v38, %v554_v60 }
 0x11b   : > { %6762 = vmatprep.subr.mxu1 %v7528_v0  ;;  %6758 = vmatpush3.msra.mxu0 %v8216_v19 }
 0x11c   : > { %6763 = vmatpush3.msra.mxu1 %v2275_v26  ;;  %6773 = vmatprep.subr.mxu0 %v7528_v0 }
 0x11d   : > { %6760 = vmatmul.mubr.f32.vlgmr.msra.gmra.mxu0 %v8154_v2  ;;  %6764 = vmatprep.subr.mxu1 %v7528_v0 }
 0x11e   : > { %6774 = vmatpush3.msra.mxu0 %v8189_v11  ;;  %6765 = vmatpush3.msra.mxu1 %v2282_v31 }
 0x11f   : > { %6775 = vmatprep.subr.mxu0 %v7528_v0  ;;  %6766 = vmatprep.subr.mxu1 %v7528_v0 }
 0x120   : > { %6776 = vmatpush3.msra.mxu0 %v8212_v18  ;;  %6767 = vmatpush3.msra.mxu1 %v2289_v34  ;;  %v1604_v34 = vld [vmem:[#allocation11] sm:$0x7] }
 0x121   : > { %6777 = vmatprep.subr.mxu0 %v7528_v0  ;;  %6768 = vmatprep.subr.mxu1 %v7528_v0  ;;  %v1609_v32 = vrot.slane %v1604_v34, %v546_v37 }
 0x122   : > { %6778 = vmatpush3.msra.mxu0 %v2286_v20  ;;  %6769 = vmatpush3.msra.mxu1 %v2296_v35 }
 0x123   : > { %6779 = vmatprep.subr.mxu0 %v7528_v0  ;;  %6770 = vmatprep.mubr.msk.f32.mxu1 %vm7529_vm1, %v7528_v0 }
 0x124   : > { %6780 = vmatpush3.msra.mxu0 %v2293_v23  ;;  %6781 = vmatprep.mubr.msk.f32.mxu0 %vm7529_vm1, %v7528_v0 }
 0x125   : > { %6784 = vmatprep.subr.mxu1 %v7528_v0  ;;  %6795 = vmatprep.subr.mxu0 %v7528_v0 }
 0x126   : > { %6771 = vmatmul.mubr.f32.vlgmr.msra.gmra.mxu1 %v8040_v29  ;;  %6782 = vmatmul.mubr.f32.vlgmr.msra.gmra.mxu0 %v8077_v42  ;;  %v547_v42 = vrot.slane %v542_v38, %v546_v37 }
 0x127   : > { %6785 = vmatpush3.msra.mxu1 %v8177_v6  ;;  %6796 = vmatpush3.msra.mxu0 %v2273_v17 }
 0x128   : > { %6786 = vmatprep.subr.mxu1 %v7528_v0  ;;  %6797 = vmatprep.subr.mxu0 %v7528_v0 }
 0x129   : > { %6787 = vmatpush3.msra.mxu1 %v8194_v12  ;;  %6798 = vmatpush3.msra.mxu0 %v2280_v22 }
 0x12a   : > { %6788 = vmatprep.subr.mxu1 %v7528_v0  ;;  %6799 = vmatprep.subr.mxu0 %v7528_v0 }
 0x12b   : > { %6789 = vmatpush3.msra.mxu1 %v8205_v15  ;;  %6800 = vmatpush3.msra.mxu0 %v2287_v27 }
 0x12c   : > { %6790 = vmatprep.subr.mxu1 %v7528_v0  ;;  %6801 = vmatprep.subr.mxu0 %v7528_v0 }
 0x12d   : > { %6791 = vmatpush3.msra.mxu1 %v8216_v19  ;;  %6802 = vmatpush3.msra.mxu0 %v2294_v30 }
 0x12e   : > { %6792 = vmatprep.mubr.msk.f32.mxu1 %vm7529_vm1, %v7528_v0  ;;  %6803 = vmatprep.mubr.msk.f32.mxu0 %vm7529_vm1, %v7528_v0 }
 0x12f   : > { %6806 = vmatprep.subr.mxu1 %v7528_v0  ;;  %6817 = vmatprep.subr.mxu0 %v7528_v0 }
 0x130   : > { %6793 = vmatmul.mubr.f32.vlgmr.msra.gmra.mxu1 %v8107_v49  ;;  %6804 = vmatmul.mubr.f32.vlgmr.msra.gmra.mxu0 %v8040_v29 }
 0x131   : > { %6807 = vmatpush3.msra.mxu1 %v8177_v6  ;;  %6819 = vmatprep.mubr.msk.f32.mxu0 %vm7529_vm1, %v7528_v0 }
 0x132   : > { %6808 = vmatprep.subr.mxu1 %v7528_v0  ;;  %6814 = vmatprep.mubr.msk.f32.mxu1 %vm7529_vm1, %v7528_v0 }
 0x133   : > { %6809 = vmatpush3.msra.mxu1 %v8194_v12 }
 0x134   : > { %6810 = vmatprep.subr.mxu1 %v7528_v0 }
 0x135   : > { %6811 = vmatpush3.msra.mxu1 %v8205_v15 }
 0x136   : > { %6812 = vmatprep.subr.mxu1 %v7528_v0 }
 0x137   : > { %6813 = vmatpush3.msra.mxu1 %v8216_v19 }
 0x138   : > { %6815 = vmatmul.mubr.f32.vlgmr.msra.gmra.mxu1 %v8040_v29  ;;  %6822 = vmatprep.subr.mxu1 %v7528_v0  ;;  %v551_v29 = vrot.slane %v542_v38, %v550_v39  ;;  %v1613_v38 = vrot.slane %v1604_v34, %v550_v39 }
 0x139   : > { %6824 = vmatprep.mubr.msk.f32.mxu1 %vm7529_vm1, %v7528_v0 }
 0x185   : > { %v642_v41 = vpop.f32.mrf.mxu0 }
 0x186   : > { %v643_v45 = vadd.f32 %v642_v41, %v547_v42 }
 0x187   : > { %v644_v43 = vpop.f32.mrf.mxu0 }
 0x188   : > { %v645_v46 = vadd.f32 %v644_v43, %v551_v29 }
 0x189   : > { %v754_v44 = vpop.f32.mrf.mxu1 }
 0x18a   : > { %v755_v40 = vadd.f32 %v754_v44, %v643_v45 }
 0x18b   : > { %v756_v47 = vpop.f32.mrf.mxu1 }
 0x18c   : > { %v757_v50 = vadd.f32 %v756_v47, %v645_v46 }
 0x18d   : > { %v843_v48 = vpop.f32.mrf.mxu0 }
 0x18e   : > { %v844_v52 = vadd.f32 %v843_v48, %v755_v40 }
 0x18f   : > { %v845_v51 = vpop.f32.mrf.mxu0 }
 0x190   : > { %v846_v55 = vadd.f32 %v845_v51, %v757_v50 }
 0x193   : > { %v925_v49 = vpop.f32.mrf.mxu1 }
 0x194   : > { %v926_v56 = vadd.f32 %v925_v49, %v844_v52 }
 0x195   : > { %v927_v53 = vpop.f32.mrf.mxu1 }
 0x196   : > { %v1021_v54 = vpop.f32.mrf.mxu0  ;;  %v928_v57 = vadd.f32 %v927_v53, %v846_v55 }
 0x197   : > { %v1022_v59 = vadd.f32 %v1021_v54, %v926_v56 }
 0x198   : > { %v1023_v58 = vpop.f32.mrf.mxu0 }
 0x199   : > { %v1024_v62 = vadd.f32 %v1023_v58, %v928_v57 }
 0x19d   : > { %v1101_v61 = vpop.f32.mrf.mxu1 }
 0x19e   : > { %v8303_v63 = vadd.f32 %v1101_v61, %v1022_v59 }
 0x19f   : > { %v1103_v1 = vpop.f32.mrf.mxu1 }
 0x1a0   : > { %v8306_v3 = vand.u32 4294901760, %v8303_v63  ;;  %v1104_v2 = vadd.f32 %v1103_v1, %v1024_v62 }
 0x1a1   : > { %v1181_v8 = vpop.f32.mrf.mxu0 }
 0x1a2   : > { %v8312_v9 = vsub.f32 %v8303_v63, %v8306_v3  ;;  %v8314_v4 = vand.u32 4294901760, %v1104_v2  ;;  %v1182_v5 = vadd.f32 %v1181_v8, %v555_v7 }
 0x1a3   : > { %v6695_v25 = vpop.f32.mrf.mxu0 }
 0x1a4   : > { %v8317_v13 = vsub.f32 %v1104_v2, %v8314_v4  ;;  %6818 = vmatpush3.xpose.msra.mxu0 %v8314_v4  ;;  %v8321_v6 = vand.u32 4294901760, %v8312_v9  ;;  %v1617_v25 = vrot.slane %v1604_v34, %v554_v60 }
 0x1a5   : > { %6827 = vmatprep.subr.mxu0 %v7528_v0 }
 0x1a6   : > { %v8325_v10 = vand.u32 4294901760, %v8317_v13  ;;  %v2722_v11 = vsub.f32 %v8312_v9, %v8321_v6 }
 0x1a7   : > { %v1272_v12 = vpop.f32.mrf.mxu1 }
 0x1a8   : > { %v1273_v14 = vadd.f32 %v1272_v12, %v1182_v5  ;;  %v8329_v15 = vand.u32 4294901760, %v2722_v11  ;;  %v2763_v16 = vsub.f32 %v8317_v13, %v8325_v10 }
 0x1a9   : > { %v6706_v17 = vpop.f32.mrf.mxu1 }
 0x1aa   : > { %6820 = vmatmul.mubr.f32.vlgmr.msra.gmra.mxu0 %v8329_v15  ;;  %v8334_v18 = vand.u32 4294901760, %v2763_v16 }
 0x1ab   : > { %v1352_v19 = vpop.f32.mrf.mxu0  ;;  %6828 = vmatpush3.xpose.msra.mxu0 %v8317_v13  ;;  %6829 = vmatprep.mubr.msk.f32.mxu0 %vm7529_vm1, %v7528_v0 }
 0x1ac   : > { %v1353_v20 = vadd.f32 %v1352_v19, %v1273_v14  ;;  %6823 = vmatpush3.xpose.msra.mxu1 %v8334_v18  ;;  %6837 = vmatprep.subr.mxu0 %v7528_v0 }
 0x1ad   : > { %v6717_v21 = vpop.f32.mrf.mxu0  ;;  %6832 = vmatprep.subr.mxu1 %v7528_v0 }
 0x1ae   : > { %6830 = vmatmul.mubr.f32.vlgmr.msra.gmra.mxu0 %v8312_v9 }
 0x1af   : > { %6838 = vmatpush3.xpose.msra.mxu0 %v8325_v10  ;;  %6825 = vmatmul.mubr.f32.vlgmr.msra.gmra.mxu1 %v8306_v3 }
 0x1b0   : > { %6833 = vmatpush3.xpose.msra.mxu1 %v8314_v4  ;;  %6839 = vmatprep.mubr.msk.f32.mxu0 %vm7529_vm1, %v7528_v0 }
 0x1b1   : > { %v1429_v22 = vpop.f32.mrf.mxu1  ;;  %6834 = vmatprep.mubr.msk.f32.mxu1 %vm7529_vm1, %v7528_v0  ;;  %6842 = vmatprep.subr.mxu1 %v7528_v0 }
 0x1b2   : > { %v1430_v23 = vadd.f32 %v1429_v22, %v1353_v20  ;;  %6840 = vmatmul.mubr.f32.vlgmr.msra.gmra.mxu0 %v8306_v3  ;;  %6847 = vmatprep.subr.mxu0 %v7528_v0 }
 0x1b3   : > { %v6728_v24 = vpop.f32.mrf.mxu1  ;;  %6835 = vmatmul.mubr.f32.vlgmr.msra.gmra.mxu1 %v8321_v6  ;;  %6849 = vmatprep.mubr.msk.f32.mxu0 %vm7529_vm1, %v7528_v0 }
 0x1b4   : > { %v1512_v26 = vpop.f32.mrf.mxu0  ;;  %6843 = vmatpush3.xpose.msra.mxu1 %v8314_v4  ;;  %6844 = vmatprep.mubr.msk.f32.mxu1 %vm7529_vm1, %v7528_v0 }
 0x1b5   : > { %v1513_v27 = vadd.f32 %v1512_v26, %v1430_v23  ;;  %6852 = vmatprep.subr.mxu1 %v7528_v0 }
 0x1b6   : > { %v6739_v28 = vpop.f32.mrf.mxu0 }
 0x1b7   : > { %6845 = vmatmul.mubr.f32.vlgmr.msra.gmra.mxu1 %v8306_v3 }
 0x1b8   : > { %6854 = vmatprep.mubr.msk.f32.mxu1 %vm7529_vm1, %v7528_v0 }
 0x1bb   : > { %v1587_v30 = vpop.f32.mrf.mxu1 }
 0x1bc   : > { %v8363_v31 = vadd.f32 %v1587_v30, %v1513_v27 }
 0x1bd   : > { %v6750_v33 = vpop.f32.mrf.mxu1 }
 0x1bf   : > { %v1703_v35 = vpop.f32.mrf.mxu0 }
 0x1c0   : > { %v1704_v29 = vadd.f32 %v1703_v35, %v1609_v32  ;;  %v2652_v35 = vld [vmem:[%s8706_s6] sm:$0xff] }
 0x1c1   : > { %v1705_v41 = vpop.f32.mrf.mxu0 }
 0x1c2   : > { %v1706_v43 = vadd.f32 %v1705_v41, %v1613_v38 }
 0x1c5   : > { %v1815_v42 = vpop.f32.mrf.mxu1 }
 0x1c6   : > { %v1816_v46 = vadd.f32 %v1815_v42, %v1704_v29 }
 0x1c7   : > { %v1817_v44 = vpop.f32.mrf.mxu1 }
 0x1c8   : > { %v1904_v45 = vpop.f32.mrf.mxu0  ;;  %v1818_v47 = vadd.f32 %v1817_v44, %v1706_v43 }
 0x1c9   : > { %v1905_v49 = vadd.f32 %v1904_v45, %v1816_v46 }
 0x1ca   : > { %v1906_v40 = vpop.f32.mrf.mxu0 }
 0x1cb   : > { %v1907_v52 = vadd.f32 %v1906_v40, %v1818_v47 }
 0x1cf   : > { %v1986_v48 = vpop.f32.mrf.mxu1 }
 0x1d0   : > { %v1987_v53 = vadd.f32 %v1986_v48, %v1905_v49 }
 0x1d1   : > { %v1988_v50 = vpop.f32.mrf.mxu1 }
 0x1d2   : > { %v2082_v51 = vpop.f32.mrf.mxu0  ;;  %v1989_v54 = vadd.f32 %v1988_v50, %v1907_v52 }
 0x1d3   : > { %v2083_v55 = vadd.f32 %v2082_v51, %v1987_v53 }
 0x1d4   : > { %v2084_v37 = vpop.f32.mrf.mxu0 }
 0x1d5   : > { %v2085_v39 = vadd.f32 %v2084_v37, %v1989_v54 }
 0x1d9   : > { %v2162_v56 = vpop.f32.mrf.mxu1 }
 0x1da   : > { %v8369_v57 = vadd.f32 %v2162_v56, %v2083_v55  ;;  %v3099_v56 = vld [vmem:[#allocation13] sm:$0xff] }
 0x1db   : > { %v2164_v58 = vpop.f32.mrf.mxu1 }
 0x1dc   : > { %v2165_v59 = vadd.f32 %v2164_v58, %v2085_v39  ;;  %v8372_v61 = vand.u32 4294901760, %v8369_v57 }
 0x1dd   : > { %v2242_v62 = vpop.f32.mrf.mxu0 }
 0x1de   : > { %v8374_v1 = vand.u32 4294901760, %v2165_v59  ;;  %v8382_v8 = vsub.f32 %v8369_v57, %v8372_v61  ;;  %v2243_v36 = vadd.f32 %v2242_v62, %v1617_v25 }
 0x1df   : > { %v6761_v2 = vpop.f32.mrf.mxu0 }
 0x1e0   : > { %v8377_v7 = vsub.f32 %v2165_v59, %v8374_v1  ;;  %6848 = vmatpush3.xpose.msra.mxu0 %v8374_v1  ;;  %v8398_v12 = vand.u32 4294901760, %v8382_v8 }
 0x1e1   : > { %6857 = vmatprep.subr.mxu0 %v7528_v0 }
 0x1e2   : > { %v8388_v5 = vand.u32 4294901760, %v8377_v7  ;;  %v3616_v17 = vsub.f32 %v8382_v8, %v8398_v12 }
 0x1e3   : > { %6850 = vmatmul.mubr.f32.vlgmr.msra.gmra.mxu0 %v8329_v15 }
 0x1e4   : > { %6858 = vmatpush3.xpose.msra.mxu0 %v8377_v7  ;;  %6859 = vmatprep.mubr.msk.f32.mxu0 %vm7529_vm1, %v7528_v0  ;;  %v3210_v11 = vsub.f32 %v8377_v7, %v8388_v5 }
 0x1e5   : > { %6867 = vmatprep.subr.mxu0 %v7528_v0 }
 0x1e6   : > { %v8400_v60 = vand.u32 4294901760, %v3210_v11  ;;  %v2333_v14 = vpop.f32.mrf.mxu1  ;;  %v2413_v15 = vpop.f32.mrf.mxu0 }
 0x1e7   : > { %6860 = vmatmul.mubr.f32.vlgmr.msra.gmra.mxu0 %v8312_v9  ;;  %v2334_v19 = vadd.f32 %v2333_v14, %v2243_v36  ;;  %v3617_v9 = vand.u32 4294901760, %v3616_v17  ;;  %v3546_v14 = vld [vmem:[#allocation14] sm:$0xff] }
 0x1e8   : > { %6853 = vmatpush3.xpose.msra.mxu1 %v8400_v60  ;;  %6868 = vmatpush3.xpose.msra.mxu0 %v8388_v5  ;;  %v6772_v16 = vpop.f32.mrf.mxu1  ;;  %v6783_v20 = vpop.f32.mrf.mxu0 }
 0x1e9   : > { %6869 = vmatprep.mubr.msk.f32.mxu0 %vm7529_vm1, %v7528_v0  ;;  %6862 = vmatprep.subr.mxu1 %v7528_v0  ;;  %v2414_v21 = vadd.f32 %v2413_v15, %v2334_v19 }
 0x1ea   : > { %6877 = vmatprep.subr.mxu0 %v7528_v0 }
 0x1eb   : > { %6855 = vmatmul.mubr.f32.vlgmr.msra.gmra.mxu1 %v8306_v3  ;;  %6870 = vmatmul.mubr.f32.vlgmr.msra.gmra.mxu0 %v8306_v3 }
 0x1ec   : > { %6863 = vmatpush3.xpose.msra.mxu1 %v8374_v1  ;;  %6878 = vmatpush3.xpose.msra.mxu0 %v8314_v4 }
 0x1ed   : > { %6864 = vmatprep.mubr.msk.f32.mxu1 %vm7529_vm1, %v7528_v0  ;;  %6879 = vmatprep.mubr.msk.f32.mxu0 %vm7529_vm1, %v7528_v0 }
 0x1ee   : > { %6872 = vmatprep.subr.mxu1 %v7528_v0  ;;  %6887 = vmatprep.subr.mxu0 %v7528_v0 }
 0x1ef   : > { %6865 = vmatmul.mubr.f32.vlgmr.msra.gmra.mxu1 %v8321_v6  ;;  %6880 = vmatmul.mubr.f32.vlgmr.msra.gmra.mxu0 %v3617_v9 }
 0x1f0   : > { %6873 = vmatpush3.xpose.msra.mxu1 %v8374_v1  ;;  %6888 = vmatpush3.xpose.msra.mxu0 %v8317_v13  ;;  %v2490_v22 = vpop.f32.mrf.mxu1  ;;  %v2573_v23 = vpop.f32.mrf.mxu0 }
 0x1f1   : > { %6874 = vmatprep.mubr.msk.f32.mxu1 %vm7529_vm1, %v7528_v0  ;;  %6889 = vmatprep.mubr.msk.f32.mxu0 %vm7529_vm1, %v7528_v0  ;;  %v2491_v24 = vadd.f32 %v2490_v22, %v2414_v21 }
 0x1f2   : > { %6882 = vmatprep.subr.mxu1 %v7528_v0  ;;  %6897 = vmatprep.subr.mxu0 %v7528_v0  ;;  %v6794_v26 = vpop.f32.mrf.mxu1  ;;  %v6805_v6 = vpop.f32.mrf.mxu0 }
 0x1f3   : > { %6875 = vmatmul.mubr.f32.vlgmr.msra.gmra.mxu1 %v8306_v3  ;;  %6890 = vmatmul.mubr.f32.vlgmr.msra.gmra.mxu0 %v8382_v8  ;;  %v2574_v13 = vadd.f32 %v2573_v23, %v2491_v24 }
 0x1f4   : > { %6883 = vmatpush3.xpose.msra.mxu1 %v8334_v18  ;;  %6898 = vmatpush3.xpose.msra.mxu0 %v8325_v10 }
 0x1f5   : > { %6884 = vmatprep.mubr.msk.f32.mxu1 %vm7529_vm1, %v7528_v0  ;;  %6899 = vmatprep.mubr.msk.f32.mxu0 %vm7529_vm1, %v7528_v0 }
 0x1f6   : > { %6892 = vmatprep.subr.mxu1 %v7528_v0  ;;  %6907 = vmatprep.subr.mxu0 %v7528_v0 }
 0x1f7   : > { %6885 = vmatmul.mubr.f32.vlgmr.msra.gmra.mxu1 %v8372_v61  ;;  %6900 = vmatmul.mubr.f32.vlgmr.msra.gmra.mxu0 %v8372_v61 }
 0x1f8   : > { %6893 = vmatpush3.xpose.msra.mxu1 %v8314_v4  ;;  %6908 = vmatpush3.xpose.msra.mxu0 %v8374_v1  ;;  %v2648_v3 = vpop.f32.mrf.mxu1 }
 0x1f9   : > { %6894 = vmatprep.mubr.msk.f32.mxu1 %vm7529_vm1, %v7528_v0  ;;  %6909 = vmatprep.mubr.msk.f32.mxu0 %vm7529_vm1, %v7528_v0  ;;  %v2649_v10 = vadd.f32 %v2648_v3, %v2574_v13 }
 0x1fa   : > { %6902 = vmatprep.subr.mxu1 %v7528_v0  ;;  %6917 = vmatprep.subr.mxu0 %v7528_v0  ;;  %v6816_v18 = vpop.f32.mrf.mxu1 }
 0x1fb   : > { %6895 = vmatmul.mubr.f32.vlgmr.msra.gmra.mxu1 %v8398_v12  ;;  %6910 = vmatmul.mubr.f32.vlgmr.msra.gmra.mxu0 %v3617_v9  ;;  %v8451_v27 = vand.u32 4294901760, %v2649_v10 }
 0x1fc   : > { %6903 = vmatpush3.xpose.msra.mxu1 %v8314_v4  ;;  %6918 = vmatpush3.xpose.msra.mxu0 %v8377_v7 }
 0x1fd   : > { %6904 = vmatprep.mubr.msk.f32.mxu1 %vm7529_vm1, %v7528_v0  ;;  %6919 = vmatprep.mubr.msk.f32.mxu0 %vm7529_vm1, %v7528_v0  ;;  %v8460_v28 = vsub.f32 %v2649_v10, %v8451_v27 }
 0x1fe   : > { %6912 = vmatprep.subr.mxu1 %v7528_v0  ;;  %6927 = vmatprep.subr.mxu0 %v7528_v0 }
 0x1ff   : > { %6905 = vmatmul.mubr.f32.vlgmr.msra.gmra.mxu1 %v8372_v61  ;;  %6920 = vmatmul.mubr.f32.vlgmr.msra.gmra.mxu0 %v8382_v8  ;;  %v8469_v4 = vand.u32 4294901760, %v8460_v28 }
 0x200   : > { %6913 = vmatpush3.xpose.msra.mxu1 %v8400_v60  ;;  %6928 = vmatpush3.xpose.msra.mxu0 %v8388_v5 }
 0x201   : > { %6914 = vmatprep.mubr.msk.f32.mxu1 %vm7529_vm1, %v7528_v0  ;;  %6929 = vmatprep.mubr.msk.f32.mxu0 %vm7529_vm1, %v7528_v0  ;;  %v4574_v30 = vsub.f32 %v8460_v28, %v8469_v4 }
 0x202   : > { %6922 = vmatprep.subr.mxu1 %v7528_v0  ;;  %6937 = vmatprep.subr.mxu0 %v7528_v0 }
 0x203   : > { %6915 = vmatmul.mubr.f32.vlgmr.msra.gmra.mxu1 %v8372_v61  ;;  %6930 = vmatmul.mubr.f32.vlgmr.msra.gmra.mxu0 %v8372_v61  ;;  %v8493_v33 = vand.u32 4294901760, %v4574_v30 }
 0x204   : > { %6923 = vmatpush3.xpose.msra.mxu1 %v8374_v1  ;;  %6924 = vmatprep.mubr.msk.f32.mxu1 %vm7529_vm1, %v7528_v0 }
 0x205   : > { %6932 = vmatprep.subr.mxu1 %v7528_v0  ;;  %6938 = vmatpush3.msra.mxu0 %v8451_v27 }
 0x206   : > { %6939 = vmatprep.mubr.msk.f32.mxu0 %vm7529_vm1, %v7528_v0  ;;  %6947 = vmatprep.subr.mxu0 %v7528_v0 }
 0x207   : > { %6925 = vmatmul.mubr.f32.vlgmr.msra.gmra.mxu1 %v8398_v12 }
 0x208   : > { %6933 = vmatpush3.xpose.msra.mxu1 %v8374_v1  ;;  %6934 = vmatprep.mubr.msk.f32.mxu1 %vm7529_vm1, %v7528_v0 }
 0x209   : > { %6942 = vmatprep.subr.mxu1 %v7528_v0 }
 0x20b   : > { %6935 = vmatmul.mubr.f32.vlgmr.msra.gmra.mxu1 %v8372_v61 }
 0x20c   : > { %6943 = vmatpush3.msra.mxu1 %v8493_v33  ;;  %6944 = vmatprep.mubr.msk.f32.mxu1 %vm7529_vm1, %v7528_v0 }
 0x20d   : > { %6952 = vmatprep.subr.mxu1 %v7528_v0 }
 0x26a   : > { %v2725_v34 = vpop.f32.mrf.mxu0 }
 0x26b   : > { %v2726_v38 = vadd.f32 %v2725_v34, %v2652_v35 }
 0x26c   : > { %v6821_v32 = vpop.f32.mrf.mxu0 }
 0x26d   : > { %v3993_v32 = vld [vmem:[%s8709_s9] sm:$0xff] }
 0x26e   : > { %v2875_v41 = vpop.f32.mrf.mxu0 }
 0x26f   : > { %v2801_v42 = vpop.f32.mrf.mxu1 }
 0x270   : > { %v2802_v29 = vadd.f32 %v2801_v42, %v2726_v38  ;;  %v6831_v43 = vpop.f32.mrf.mxu0 }
 0x271   : > { %v6826_v44 = vpop.f32.mrf.mxu1 }
 0x272   : > { %v3023_v45 = vpop.f32.mrf.mxu0  ;;  %v2876_v46 = vadd.f32 %v2875_v41, %v2802_v29 }
 0x273   : > { %v2949_v47 = vpop.f32.mrf.mxu1 }
 0x274   : > { %v2950_v48 = vadd.f32 %v2949_v47, %v2876_v46  ;;  %v6841_v40 = vpop.f32.mrf.mxu0 }
 0x275   : > { %v6836_v49 = vpop.f32.mrf.mxu1 }
 0x276   : > { %v3024_v50 = vadd.f32 %v3023_v45, %v2950_v48 }
 0x277   : > { %v3095_v51 = vpop.f32.mrf.mxu1 }
 0x278   : > { %v8504_v52 = vadd.f32 %v3095_v51, %v3024_v50 }
 0x279   : > { %v6846_v53 = vpop.f32.mrf.mxu1 }
 0x27a   : > { %v4441_v54 = vsel %vm4440_vm2, %v8504_v52, -inf }
 0x27b   : > { %4442 = vmax.xlane.f32.xlu0 %v4441_v54 }
 0x2a3   : > { %v3172_v37 = vpop.f32.mrf.mxu0 }
 0x2a4   : > { %v3173_v59 = vadd.f32 %v3172_v37, %v3099_v56 }
 0x2a5   : > { %v6851_v55 = vpop.f32.mrf.mxu0 }
 0x2a7   : > { %v3322_v39 = vpop.f32.mrf.mxu0 }
 0x2a9   : > { %v6861_v58 = vpop.f32.mrf.mxu0 }
 0x2ab   : > { %v3248_v61 = vpop.f32.mrf.mxu1  ;;  %v3470_v62 = vpop.f32.mrf.mxu0 }
 0x2ac   : > { %v3249_v1 = vadd.f32 %v3248_v61, %v3173_v59 }
 0x2ad   : > { %v6856_v2 = vpop.f32.mrf.mxu1  ;;  %v6871_v7 = vpop.f32.mrf.mxu0 }
 0x2ae   : > { %v3323_v8 = vadd.f32 %v3322_v39, %v3249_v1 }
 0x2af   : > { %v3396_v25 = vpop.f32.mrf.mxu1  ;;  %v3619_v5 = vpop.f32.mrf.mxu0 }
 0x2b0   : > { %v3397_v11 = vadd.f32 %v3396_v25, %v3323_v8  ;;  %v3620_v9 = vadd.f32 %v3619_v5, %v3546_v14  ;;  %v8516_v25 = vand.u32 4294901760, %v8363_v31 }
 0x2b1   : > { %v6866_v12 = vpop.f32.mrf.mxu1  ;;  %v6881_v36 = vpop.f32.mrf.mxu0 }
 0x2b2   : > { %v3471_v60 = vadd.f32 %v3470_v62, %v3397_v11  ;;  %v8520_v11 = vsub.f32 %v8363_v31, %v8516_v25 }
 0x2b3   : > { %v3542_v15 = vpop.f32.mrf.mxu1  ;;  %v3769_v16 = vpop.f32.mrf.mxu0 }
 0x2b4   : > { %v3543_v17 = vadd.f32 %v3542_v15, %v3471_v60 }
 0x2b5   : > { %v6876_v19 = vpop.f32.mrf.mxu1  ;;  %v6891_v20 = vpop.f32.mrf.mxu0 }
 0x2b6   : > { %v4444_v21 = vsel %vm4440_vm2, %v3543_v17, -inf }
 0x2b7   : > { %v3695_v22 = vpop.f32.mrf.mxu1  ;;  %4445 = vmax.xlane.f32.xlu0 %v4444_v21  ;;  %v3917_v23 = vpop.f32.mrf.mxu0 }
 0x2b8   : > { %v3696_v24 = vadd.f32 %v3695_v22, %v3620_v9 }
 0x2b9   : > { %v6886_v26 = vpop.f32.mrf.mxu1  ;;  %v6901_v6 = vpop.f32.mrf.mxu0 }
 0x2ba   : > { %v3770_v13 = vadd.f32 %v3769_v16, %v3696_v24  ;;  %v8526_v16 = vand.u32 4294901760, %v8520_v11 }
 0x2bb   : > { %v3843_v3 = vpop.f32.mrf.mxu1  ;;  %v4066_v10 = vpop.f32.mrf.mxu0 }
 0x2bc   : > { %v3844_v18 = vadd.f32 %v3843_v3, %v3770_v13  ;;  %v4067_v44 = vadd.f32 %v4066_v10, %v3993_v32  ;;  %v5023_v24 = vsub.f32 %v8520_v11, %v8526_v16 }
 0x2bd   : > { %v6896_v30 = vpop.f32.mrf.mxu1  ;;  %v6911_v34 = vpop.f32.mrf.mxu0 }
 0x2be   : > { %v3918_v35 = vadd.f32 %v3917_v23, %v3844_v18  ;;  %v8542_v18 = vand.u32 4294901760, %v5023_v24 }
 0x2bf   : > { %v3989_v38 = vpop.f32.mrf.mxu1  ;;  %v4216_v41 = vpop.f32.mrf.mxu0 }
 0x2c0   : > { %v3990_v42 = vadd.f32 %v3989_v38, %v3918_v35 }
 0x2c1   : > { %v6906_v29 = vpop.f32.mrf.mxu1  ;;  %v6921_v43 = vpop.f32.mrf.mxu0 }
 0x2c2   : > { %v5363_v45 = vsel %vm4440_vm2, %v3990_v42, -inf }
 0x2c3   : > { %v4142_v46 = vpop.f32.mrf.mxu1  ;;  %5364 = vmax.xlane.f32.xlu1 %v5363_v45  ;;  %v4364_v47 = vpop.f32.mrf.mxu0 }
 0x2c4   : > { %v4143_v48 = vadd.f32 %v4142_v46, %v4067_v44 }
 0x2c5   : > { %v6916_v40 = vpop.f32.mrf.mxu1  ;;  %v6931_v49 = vpop.f32.mrf.mxu0 }
 0x2c6   : > { %v4217_v50 = vadd.f32 %v4216_v41, %v4143_v48 }
 0x2c7   : > { %v4290_v51 = vpop.f32.mrf.mxu1 }
 0x2c8   : > { %v4291_v53 = vadd.f32 %v4290_v51, %v4217_v50 }
 0x2c9   : > { %v6926_v54 = vpop.f32.mrf.mxu1 }
 0x2ca   : > { %v4365_v37 = vadd.f32 %v4364_v47, %v4291_v53 }
 0x2cb   : > { %v4436_v55 = vpop.f32.mrf.mxu1 }
 0x2cc   : > { %v4437_v56 = vadd.f32 %v4436_v55, %v4365_v37 }
 0x2cd   : > { %v6936_v39 = vpop.f32.mrf.mxu1 }
 0x2ce   : > { %v5366_v58 = vsel %vm4440_vm2, %v4437_v56, -inf }
 0x2cf   : > { %5367 = vmax.xlane.f32.xlu1 %v5366_v58 }
 0x304   : > { %v4443_v59 = vpop.xlane.xlu0 %4442 }
 0x340   : > { %v4446_v61 = vpop.xlane.xlu0 %4445 }
 0x341   : > { %v4447_v62 = vmax.f32 %v4443_v59, %v4446_v61 }
 0x343   : > { %v4448_v1 = vsub.f32 %v8504_v52, %v4447_v62  ;;  %v4451_v2 = vsub.f32 %v3543_v17, %v4447_v62 }
 0x345   : > { %v4449_v7 = vmul.f32 1.442695, %v4448_v1  ;;  %v4452_v8 = vmul.f32 1.442695, %v4451_v2 }
 0x347   : > { %7178 = vpow2.f32 %v4449_v7 }
 0x348   : > { %7180 = vpow2.f32 %v4452_v8 }
 0x34c   : > { %v5365_v12 = vpop.xlane.xlu1 %5364 }
 0x354   : > { %v7179_v5 = vpop.eup %7178 }
 0x355   : > { %v7181_v36 = vpop.eup %7180  ;;  %v4454_v60 = vsel %vm4440_vm2, %v7179_v5, 0.0  ;;  %v4911_v19 = vsel %vm4440_vm2, %v7179_v5, 0 }
 0x356   : > { %4455 = vadd.xlane.f32.xlu0 %v4454_v60  ;;  %v4457_v52 = vsel %vm4440_vm2, %v7181_v36, 0.0  ;;  %v4462_v14 = vsel %vm4440_vm2, %v7181_v36, 0  ;;  %v8533_v23 = vand.u32 4294901760, %v4911_v19 }
 0x357   : > { %4458 = vadd.xlane.f32.xlu1 %v4457_v52  ;;  %v4530_v15 = vand.u32 4294901760, %v4462_v14 }
 0x358   : > { %v5368_v17 = vpop.xlane.xlu1 %5367  ;;  %v4980_v10 = vsub.f32 %v4911_v19, %v8533_v23 }
 0x359   : > { %v4531_v20 = vsub.f32 %v4462_v14, %v4530_v15  ;;  %6945 = vmatmul.mubr.f32.vlgmr.msra.gmra.mxu1 %v4530_v15  ;;  %v5369_v31 = vmax.f32 %v5365_v12, %v5368_v17 }
 0x35a   : > { %6953 = vmatpush3.msra.mxu1 %v8451_v27  ;;  %6954 = vmatprep.mubr.msk.f32.mxu1 %vm7529_vm1, %v7528_v0  ;;  %v4981_v30 = vand.u32 4294901760, %v4980_v10 }
 0x35b   : > { %v5370_v9 = vsub.f32 %v3990_v42, %v5369_v31  ;;  %v5373_v21 = vsub.f32 %v4437_v56, %v5369_v31  ;;  %6962 = vmatprep.subr.mxu1 %v7528_v0  ;;  %v4532_v22 = vand.u32 4294901760, %v4531_v20 }
 0x35c   : > { %v4982_v34 = vsub.f32 %v4980_v10, %v4981_v30 }
 0x35d   : > { %v5371_v26 = vmul.f32 1.442695, %v5370_v9  ;;  %v5374_v6 = vmul.f32 1.442695, %v5373_v21  ;;  %6955 = vmatmul.mubr.f32.vlgmr.msra.gmra.mxu1 %v4532_v22  ;;  %v4533_v13 = vsub.f32 %v4531_v20, %v4532_v22 }
 0x35e   : > { %6963 = vmatpush3.msra.mxu1 %v8451_v27  ;;  %6964 = vmatprep.mubr.msk.f32.mxu1 %vm7529_vm1, %v7528_v0  ;;  %v4983_v35 = vand.u32 4294901760, %v4982_v34 }
 0x35f   : > { %7182 = vpow2.f32 %v5371_v26  ;;  %6972 = vmatprep.subr.mxu1 %v7528_v0  ;;  %v4534_v3 = vand.u32 4294901760, %v4533_v13 }
 0x360   : > { %7184 = vpow2.f32 %v5374_v6 }
 0x361   : > { %6940 = vmatmul.mubr.f32.vlgmr.msra.gmra.mxu0 %v4534_v3  ;;  %6965 = vmatmul.mubr.f32.vlgmr.msra.gmra.mxu1 %v4530_v15 }
 0x362   : > { %6948 = vmatpush3.msra.mxu0 %v8460_v28  ;;  %6973 = vmatpush3.msra.mxu1 %v8542_v18 }
 0x363   : > { %6949 = vmatprep.mubr.msk.f32.mxu0 %vm7529_vm1, %v7528_v0  ;;  %6957 = vmatprep.subr.mxu0 %v7528_v0 }
 0x364   : > { %6974 = vmatprep.mubr.msk.f32.mxu1 %vm7529_vm1, %v7528_v0  ;;  %6982 = vmatprep.subr.mxu1 %v7528_v0 }
 0x365   : > { %6950 = vmatmul.mubr.f32.vlgmr.msra.gmra.mxu0 %v4531_v20  ;;  %6975 = vmatmul.mubr.f32.vlgmr.msra.gmra.mxu1 %v8533_v23 }
 0x366   : > { %6958 = vmatpush3.msra.mxu0 %v8469_v4  ;;  %6983 = vmatpush3.msra.mxu1 %v8516_v25 }
 0x367   : > { %6959 = vmatprep.mubr.msk.f32.mxu0 %vm7529_vm1, %v7528_v0  ;;  %6967 = vmatprep.subr.mxu0 %v7528_v0 }
 0x368   : > { %6984 = vmatprep.mubr.msk.f32.mxu1 %vm7529_vm1, %v7528_v0  ;;  %6992 = vmatprep.subr.mxu1 %v7528_v0 }
 0x369   : > { %6960 = vmatmul.mubr.f32.vlgmr.msra.gmra.mxu0 %v4530_v15  ;;  %6985 = vmatmul.mubr.f32.vlgmr.msra.gmra.mxu1 %v4981_v30 }
 0x36a   : > { %6968 = vmatpush3.msra.mxu0 %v8516_v25  ;;  %6993 = vmatpush3.msra.mxu1 %v8516_v25 }
 0x36b   : > { %6969 = vmatprep.mubr.msk.f32.mxu0 %vm7529_vm1, %v7528_v0  ;;  %6977 = vmatprep.subr.mxu0 %v7528_v0 }
 0x36c   : > { %v7183_v32 = vpop.eup %7182  ;;  %6994 = vmatprep.mubr.msk.f32.mxu1 %vm7529_vm1, %v7528_v0  ;;  %7002 = vmatprep.subr.mxu1 %v7528_v0 }
 0x36d   : > { %v7185_v38 = vpop.eup %7184  ;;  %6970 = vmatmul.mubr.f32.vlgmr.msra.gmra.mxu0 %v4983_v35  ;;  %6995 = vmatmul.mubr.f32.vlgmr.msra.gmra.mxu1 %v8533_v23  ;;  %v5376_v41 = vsel %vm4440_vm2, %v7183_v32, 0.0 }
 0x36e   : > { %6978 = vmatpush3.msra.mxu0 %v8520_v11  ;;  %7003 = vmatpush3.msra.mxu1 %v8493_v33  ;;  %v5379_v42 = vsel %vm4440_vm2, %v7185_v38, 0.0  ;;  %v5384_v29 = vsel %vm4440_vm2, %v7185_v38, 0  ;;  %v5833_v33 = vsel %vm4440_vm2, %v7183_v32, 0 }
 0x36f   : > { %5380 = vadd.xlane.f32.xlu1 %v5379_v42  ;;  %5377 = vadd.xlane.f32.xlu0 %v5376_v41  ;;  %v5452_v43 = vand.u32 4294901760, %v5384_v29  ;;  %v5901_v46 = vand.u32 4294901760, %v5833_v33 }
 0x370   : > { %6979 = vmatprep.mubr.msk.f32.mxu0 %vm7529_vm1, %v7528_v0  ;;  %6987 = vmatprep.subr.mxu0 %v7528_v0 }
 0x371   : > { %7004 = vmatprep.mubr.msk.f32.mxu1 %vm7529_vm1, %v7528_v0  ;;  %7012 = vmatprep.subr.mxu1 %v7528_v0  ;;  %v5453_v44 = vsub.f32 %v5384_v29, %v5452_v43  ;;  %v5902_v40 = vsub.f32 %v5833_v33, %v5901_v46 }
 0x372   : > { %6980 = vmatmul.mubr.f32.vlgmr.msra.gmra.mxu0 %v4980_v10  ;;  %7005 = vmatmul.mubr.f32.vlgmr.msra.gmra.mxu1 %v5452_v43 }
 0x373   : > { %6988 = vmatpush3.msra.mxu0 %v8526_v16  ;;  %7013 = vmatpush3.msra.mxu1 %v8451_v27  ;;  %v5454_v45 = vand.u32 4294901760, %v5453_v44 }
 0x374   : > { %6989 = vmatprep.mubr.msk.f32.mxu0 %vm7529_vm1, %v7528_v0  ;;  %6997 = vmatprep.subr.mxu0 %v7528_v0 }
 0x375   : > { %7014 = vmatprep.mubr.msk.f32.mxu1 %vm7529_vm1, %v7528_v0  ;;  %7022 = vmatprep.subr.mxu1 %v7528_v0  ;;  %v5455_v47 = vsub.f32 %v5453_v44, %v5454_v45 }
 0x376   : > { %6990 = vmatmul.mubr.f32.vlgmr.msra.gmra.mxu0 %v8533_v23  ;;  %7015 = vmatmul.mubr.f32.vlgmr.msra.gmra.mxu1 %v5454_v45 }
 0x377   : > { %6998 = vmatpush3.msra.mxu0 %v8451_v27  ;;  %7023 = vmatpush3.msra.mxu1 %v8451_v27  ;;  %v5456_v48 = vand.u32 4294901760, %v5455_v47  ;;  %v5903_v27 = vand.u32 4294901760, %v5902_v40 }
 0x378   : > { %6999 = vmatprep.mubr.msk.f32.mxu0 %vm7529_vm1, %v7528_v0  ;;  %7007 = vmatprep.subr.mxu0 %v7528_v0 }
 0x379   : > { %7024 = vmatprep.mubr.msk.f32.mxu1 %vm7529_vm1, %v7528_v0  ;;  %7032 = vmatprep.subr.mxu1 %v7528_v0 }
 0x37a   : > { %7000 = vmatmul.mubr.f32.vlgmr.msra.gmra.mxu0 %v5456_v48  ;;  %7025 = vmatmul.mubr.f32.vlgmr.msra.gmra.mxu1 %v5452_v43 }
 0x37b   : > { %7008 = vmatpush3.msra.mxu0 %v8460_v28  ;;  %7033 = vmatpush3.msra.mxu1 %v8542_v18  ;;  %v5904_v28 = vsub.f32 %v5902_v40, %v5903_v27 }
 0x37c   : > { %7009 = vmatprep.mubr.msk.f32.mxu0 %vm7529_vm1, %v7528_v0  ;;  %7017 = vmatprep.subr.mxu0 %v7528_v0 }
 0x37d   : > { %7034 = vmatprep.mubr.msk.f32.mxu1 %vm7529_vm1, %v7528_v0  ;;  %7042 = vmatprep.subr.mxu1 %v7528_v0 }
 0x37e   : > { %7010 = vmatmul.mubr.f32.vlgmr.msra.gmra.mxu0 %v5453_v44  ;;  %7035 = vmatmul.mubr.f32.vlgmr.msra.gmra.mxu1 %v5901_v46 }
 0x37f   : > { %7018 = vmatpush3.msra.mxu0 %v8469_v4  ;;  %7043 = vmatpush3.msra.mxu1 %v8516_v25  ;;  %v5905_v4 = vand.u32 4294901760, %v5904_v28 }
 0x380   : > { %7019 = vmatprep.mubr.msk.f32.mxu0 %vm7529_vm1, %v7528_v0  ;;  %7027 = vmatprep.subr.mxu0 %v7528_v0 }
 0x381   : > { %7044 = vmatprep.mubr.msk.f32.mxu1 %vm7529_vm1, %v7528_v0  ;;  %7052 = vmatprep.subr.mxu1 %v7528_v0 }
 0x382   : > { %7020 = vmatmul.mubr.f32.vlgmr.msra.gmra.mxu0 %v5452_v43  ;;  %7045 = vmatmul.mubr.f32.vlgmr.msra.gmra.mxu1 %v5903_v27 }
 0x383   : > { %7028 = vmatpush3.msra.mxu0 %v8516_v25  ;;  %7053 = vmatpush3.msra.mxu1 %v8516_v25 }
 0x384   : > { %7029 = vmatprep.mubr.msk.f32.mxu0 %vm7529_vm1, %v7528_v0  ;;  %7037 = vmatprep.subr.mxu0 %v7528_v0 }
 0x385   : > { %7054 = vmatprep.mubr.msk.f32.mxu1 %vm7529_vm1, %v7528_v0 }
 0x386   : > { %7030 = vmatmul.mubr.f32.vlgmr.msra.gmra.mxu0 %v5905_v4  ;;  %7055 = vmatmul.mubr.f32.vlgmr.msra.gmra.mxu1 %v5901_v46 }
 0x387   : > { %7038 = vmatpush3.msra.mxu0 %v8520_v11  ;;  %7039 = vmatprep.mubr.msk.f32.mxu0 %vm7529_vm1, %v7528_v0 }
 0x388   : > { %7047 = vmatprep.subr.mxu0 %v7528_v0 }
 0x38a   : > { %7040 = vmatmul.mubr.f32.vlgmr.msra.gmra.mxu0 %v5902_v40 }
 0x38b   : > { %7048 = vmatpush3.msra.mxu0 %v8526_v16  ;;  %7049 = vmatprep.mubr.msk.f32.mxu0 %vm7529_vm1, %v7528_v0 }
 0x38e   : > { %7050 = vmatmul.mubr.f32.vlgmr.msra.gmra.mxu0 %v5901_v46 }
 0x3df   : > { %v4456_v61 = vpop.xlane.xlu0 %4455 }
 0x3e0   : > { %v4459_v62 = vpop.xlane.xlu1 %4458 }
 0x3e1   : > { %v4460_v25 = vadd.f32 %v4459_v62, %v4456_v61 }
 0x3e3   : > { %7186 = vrcp.f32 %v4460_v25 }
 0x3f0   : > { %v7187_v18 = vpop.eup %7186 }
 0x3f8   : > { %v5378_v41 = vpop.xlane.xlu0 %5377  ;;  %v5381_v42 = vpop.xlane.xlu1 %5380 }
 0x419   : > { %v4612_v49 = vpop.f32.mrf.mxu1 }
 0x41b   : > { %v6946_v50 = vpop.f32.mrf.mxu1 }
 0x41d   : > { %v4760_v51 = vpop.f32.mrf.mxu1 }
 0x41f   : > { %v6956_v53 = vpop.f32.mrf.mxu1 }
 0x421   : > { %v4536_v54 = vpop.f32.mrf.mxu0  ;;  %v4906_v37 = vpop.f32.mrf.mxu1 }
 0x422   : > { %v4613_v39 = vadd.f32 %v4612_v49, %v4536_v54 }
 0x423   : > { %v6941_v55 = vpop.f32.mrf.mxu0  ;;  %v6966_v56 = vpop.f32.mrf.mxu1 }
 0x425   : > { %v4686_v58 = vpop.f32.mrf.mxu0  ;;  %v5061_v59 = vpop.f32.mrf.mxu1 }
 0x426   : > { %v4687_v1 = vadd.f32 %v4686_v58, %v4613_v39 }
 0x427   : > { %v6951_v2 = vpop.f32.mrf.mxu0  ;;  %v6976_v7 = vpop.f32.mrf.mxu1 }
 0x428   : > { %v4761_v8 = vadd.f32 %v4760_v51, %v4687_v1 }
 0x429   : > { %v4834_v0 = vpop.f32.mrf.mxu0  ;;  %v5209_v5 = vpop.f32.mrf.mxu1 }
 0x42a   : > { %v4835_v11 = vadd.f32 %v4834_v0, %v4761_v8 }
 0x42b   : > { %v6961_v12 = vpop.f32.mrf.mxu0  ;;  %v6986_v36 = vpop.f32.mrf.mxu1 }
 0x42c   : > { %v4907_v60 = vadd.f32 %v4906_v37, %v4835_v11 }
 0x42d   : > { %v4985_v52 = vpop.f32.mrf.mxu0  ;;  %v5355_v14 = vpop.f32.mrf.mxu1 }
 0x42e   : > { %v4986_v15 = vadd.f32 %v4985_v52, %v4907_v60 }
 0x42f   : > { %v6971_v16 = vpop.f32.mrf.mxu0  ;;  %v6996_v17 = vpop.f32.mrf.mxu1 }
 0x430   : > { %v5062_v19 = vadd.f32 %v5061_v59, %v4986_v15 }
 0x432   : > { %v5135_v20 = vpop.f32.mrf.mxu0  ;;  %v5534_v31 = vpop.f32.mrf.mxu1 }
 0x433   : > { %v5136_v9 = vadd.f32 %v5135_v20, %v5062_v19 }
 0x434   : > { %v6981_v21 = vpop.f32.mrf.mxu0  ;;  %v7006_v22 = vpop.f32.mrf.mxu1 }
 0x435   : > { %v5210_v23 = vadd.f32 %v5209_v5, %v5136_v9 }
 0x436   : > { %v5283_v24 = vpop.f32.mrf.mxu0  ;;  %v5682_v26 = vpop.f32.mrf.mxu1 }
 0x437   : > { %v5284_v6 = vadd.f32 %v5283_v24, %v5210_v23 }
 0x438   : > { %v6991_v13 = vpop.f32.mrf.mxu0  ;;  %v7016_v3 = vpop.f32.mrf.mxu1 }
 0x439   : > { %v5356_v10 = vadd.f32 %v5355_v14, %v5284_v6 }
 0x43a   : > { %v5458_v30 = vpop.f32.mrf.mxu0  ;;  %v5828_v34 = vpop.f32.mrf.mxu1 }
 0x43b   : > { %v5360_v35 = vmul.f32 %v7187_v18, %v5356_v10  ;;  %v5535_v43 = vadd.f32 %v5534_v31, %v5458_v30 }
 0x43c   : > { %v7001_v32 = vpop.f32.mrf.mxu0  ;;  %v7026_v38 = vpop.f32.mrf.mxu1 }
 0x43d   : > { %v5361_v29 = vadd.f32 %v5360_v35, %v8303_v63 }
 0x43e   : > { %v5608_v44 = vpop.f32.mrf.mxu0  ;;  %v5983_v33 = vpop.f32.mrf.mxu1 }
 0x43f   : > { %v5609_v45 = vadd.f32 %v5608_v44, %v5535_v43  ;;  %5362 = vst [vmem:[%s521_s28] sm:$0xff] %v5361_v29 }
 0x440   : > { %v7011_v46 = vpop.f32.mrf.mxu0  ;;  %v7036_v47 = vpop.f32.mrf.mxu1 }
 0x441   : > { %7415 = shalt.err (!%p7412_p11)
}
 0x442   : > { %s7416_s22 = scalar_lea.hbm %s8637_s25, 128  ;;  %s7420_s15 = scalar_lea.hbm %s8710_s10, 256 }
 0x443   : > { %p7417_p12 = scmp.ne.s32.totalorder %s8637_s25, %s7416_s22  ;;  %p7421_p8 = scmp.lt.s32.totalorder %s8637_s25, %s8710_s10 }
 0x444   : > { %p7422_p9 = scmp.lt.s32.totalorder %s7420_s15, %s7416_s22 }
 0x445   : > { %p7418_p13 = pnand %p7417_p12, %p8751_p2 }
 0x446   : > { %p7423_p4 = por %p7422_p9, %p7421_p8 }
 0x447   : > { %p7419_p5 = pneg %p7418_p13 }
 0x449   : > { %p7424_p0 = pnand %p7423_p4, %p7419_p5 }
 0x44b   : > { %7427 = shalt.err (!%p7424_p0)
}
 0x44c   : > { %7085 = dma.vmem_to_hbm [thread:$0]  (%p8751_p2), %s8639_s16, 128, %s8637_s25, %s6286_s29   ;;  %v5382_v63 = vadd.f32 %v5381_v42, %v5378_v41  ;;  %v5683_v48 = vadd.f32 %v5682_v26, %v5609_v45  ;;  %v5756_v40 = vpop.f32.mrf.mxu0  ;;  %v6131_v27 = vpop.f32.mrf.mxu1 }
 0x44d   : > { %s528_s16 = scalar_lea.vmem [#allocation17], %s7803_s8  ;;  %s6315_s29 = scalar_lea.hbm %s8711_s11, %s6525_s21 }
 0x44e   : > { %v5757_v28 = vadd.f32 %v5756_v40, %v5683_v48  ;;  %v7021_v4 = vpop.f32.mrf.mxu0  ;;  %v7046_v49 = vpop.f32.mrf.mxu1  ;;  %7188 = vrcp.f32 %v5382_v63  ;;  %s6317_s2 = sshll.u32 %s528_s16, 4  ;;  %s6291_s30 = scalar_lea.sflag [#allocation18], %s7800_s12  ;;  %s6318_s2 = int_to_ptr.vmem [resolvable:$true] %s6317_s2 }
 0x44f   : > { %s7428_s4 = scalar_lea.vmem %s6318_s2, 128  ;;  %s7531_s3 = smov [#allocation17]  }
 0x450   : > { %v5829_v50 = vadd.f32 %v5828_v34, %v5757_v28  ;;  %v5907_v51 = vpop.f32.mrf.mxu0  ;;  %v6277_v53 = vpop.f32.mrf.mxu1  ;;  %p7429_p1 = scmp.ne.s32.totalorder %s6318_s2, %s7428_s4  ;;  %s7432_s24 = sshll.u32 %s7531_s3, 4  ;;  %s7433_s24 = int_to_ptr.vmem [resolvable:$false] %s7432_s24 }
 0x451   : > { %s7434_s8 = scalar_lea.vmem %s7433_s24, 256  ;;  %p7435_p7 = scmp.lt.s32.totalorder %s6318_s2, %s7433_s24 }
 0x452   : > { %v5908_v54 = vadd.f32 %v5907_v51, %v5829_v50  ;;  %v7031_v37 = vpop.f32.mrf.mxu0  ;;  %v7056_v55 = vpop.f32.mrf.mxu1  ;;  %p7430_p6 = pnand %p7429_p1, %p8751_p2  ;;  %p7436_p3 = scmp.lt.s32.totalorder %s7434_s8, %s7428_s4 }
 0x454   : > { %v5984_v56 = vadd.f32 %v5983_v33, %v5908_v54  ;;  %v6057_v39 = vpop.f32.mrf.mxu0  ;;  %p7431_p10 = pneg %p7430_p6  ;;  %p7437_p11 = por %p7436_p3, %p7435_p7 }
 0x456   : > { %v6058_v58 = vadd.f32 %v6057_v39, %v5984_v56  ;;  %v7041_v59 = vpop.f32.mrf.mxu0  ;;  %p7438_p12 = pnand %p7437_p11, %p7431_p10 }
 0x458   : > { %v6132_v61 = vadd.f32 %v6131_v27, %v6058_v58  ;;  %v6205_v62 = vpop.f32.mrf.mxu0 }
 0x45a   : > { %v6206_v1 = vadd.f32 %v6205_v62, %v6132_v61  ;;  %v7051_v2 = vpop.f32.mrf.mxu0 }
 0x45b   : > { %v7189_v8 = vpop.eup %7188 }
 0x45c   : > { %v6278_v7 = vadd.f32 %v6277_v53, %v6206_v1 }
 0x45e   : > { %v6282_v25 = vmul.f32 %v7189_v8, %v6278_v7 }
 0x460   : > { %v6283_v0 = vadd.f32 %v6282_v25, %v8369_v57 }
 0x462   : > { %6284 = vst [vmem:[%s528_s16] sm:$0xff] %v6283_v0 }
 0x463   : > { %7441 = shalt.err (!%p7438_p12)
}
 0x464   : > { %s7442_s23 = scalar_lea.hbm %s6315_s29, 128  ;;  %s7446_s22 = scalar_lea.hbm %s8711_s11, 256 }
 0x465   : > { %p7443_p13 = scmp.ne.s32.totalorder %s6315_s29, %s7442_s23  ;;  %p7447_p9 = scmp.lt.s32.totalorder %s6315_s29, %s8711_s11 }
 0x466   : > { %p7448_p4 = scmp.lt.s32.totalorder %s7446_s22, %s7442_s23 }
 0x467   : > { %p7444_p5 = pnand %p7443_p13, %p8751_p2 }
 0x468   : > { %p7449_p0 = por %p7448_p4, %p7447_p9 }
 0x469   : > { %p7445_p8 = pneg %p7444_p5 }
 0x46b   : > { %p7450_p1 = pnand %p7449_p0, %p7445_p8 }
 0x46d   : > { %7453 = shalt.err (!%p7450_p1)
}
 0x46e   : > { %7086 = dma.vmem_to_hbm [thread:$0]  (%p8751_p2), %s6318_s2, 128, %s6315_s29, %s6291_s30  }
 0x46f PF: > { %s6329_s15 = sand.u32 1, %s7504_s17   ;;  %p8752_p6 = scmp.ne.s32.totalorder %s8739_s14, 0 }
 0x470   : > { %p8753_p10 = scmp.ge.s32.totalorder %s7516_s20, 2  ;;  %s6330_s5 = scalar_lea.sflag [#allocation4], %s6329_s15 }
 0x472   : > { %p7116_p7 = pnand %p8753_p10, %p8752_p6 }
 0x474   : > { %p7117_p3 = pneg %p7116_p7 }
 0x476   : > { %7495 = dma.done.wait (%p7117_p3), %s6330_s5, 128  }
 0x477   : > { %7497 = vsyncadd (%p7117_p3), %s6330_s5, 4294967168  ;;  %s6339_s28 = scalar_lea.sflag [#allocation18], %s6329_s15 }
 0x478   : > { %7499 = dma.done.wait (%p7117_p3), %s6339_s28, 128  }
 0x479   : > { %7501 = vsyncadd (%p7117_p3), %s6339_s28, 4294967168  ;;  %s8754_s16 = sld [smem:[#allocation27_spill]]  ;;  %p34_p2 = scmp.ge.s32.totalorder %s7695_s27, 4  }
 0x47a   : > { %s8755_s19 = sld [smem:[#allocation28_spill]]  ;;  %s8756_s17 = smov %s7508_s18 }
 0x47b   : > { %s8758_s20 = smov %s7695_s27  ;;  %36 = sbr.rel (!%p34_p2) target bundleno = 19 (0x13), region = 159 }
 0x47f   : > { %s8757_s18 = smov %s8754_s16 }
 0x480   :  { %6344 = vsyncpa [#allocation3], 1 }
 0x481   :  { %6346 = vsyncpa [#allocation3 + $0x1], 1 }
 0x482   :  { %6347 = vsyncpa [#allocation6], 1 }
 0x483   :  { %6349 = vsyncpa [#allocation6 + $0x1], 1 }
 0x484   :  { %6350 = vsyncpa [#allocation9], 1 }
 0x485   :  { %6351 = vsyncpa [#allocation12], 1 }
 0x486   :  { %6352 = vsyncpa [#allocation15], 1 }
 0x487   :  { %6353 = vsyncpa [#allocation4], 1 }
 0x488   :  { %6355 = vsyncpa [#allocation4 + $0x1], 1 }
 0x489   :  { %6356 = vsyncpa [#allocation18], 1 }
 0x48a   :  { %6358 = vsyncpa [#allocation18 + $0x1], 1 }

</bundles_post_ra>
